<compile_context>
chip_gen: v7x
topology: tpu7x:2x2x1
jax: 0.10.0
libtpu: 0.0.40
codegen_flags: <defaults>
</compile_context>

<pallas_src>
import functools

import jax
import jax.numpy as jnp
from jax.experimental import pallas as pl
from jax.experimental.pallas import tpu as pltpu


def _round_up(n, m):
    return ((n + m - 1) // m) * m


def _cdiv(a, b):
    return (a + b - 1) // b


# ----------------------------------------------------------------------------
# Fused point branch (channels-major): 3 -> 64 -> 128 -> 1024 -> running max.
# ----------------------------------------------------------------------------

def _point_branch_kernel(x_ref, w1_ref, w2_ref, b2_ref, w3_ref, o_ref, acc_ref,
                         *, tile_n):
    nt = pl.program_id(2)

    @pl.when(nt == 0)
    def _():
        acc_ref[...] = jnp.full_like(acc_ref, -jnp.inf)

    x = x_ref[0]                       # (3, tile_n) f32, points on lanes
    w1 = w1_ref[0]                     # (64, 4) f32: cols 0..2 weights, col 3 = bias

    # Layer 1 (Conv1d 3->64 + folded BN/bias): K=3 would waste the MXU -> 3 VPU FMAs.
    h = (w1[:, 0:1] * x[0:1, :]
         + w1[:, 1:2] * x[1:2, :]
         + w1[:, 2:3] * x[2:3, :]
         + w1[:, 3:4])
    h = jnp.maximum(h, 0.0)            # (64, tile_n) f32

    # Layer 2 (64->128): bf16 MXU matmul, f32 accumulation, f32 epilogue.
    h = jnp.dot(w2_ref[...], h.astype(jnp.bfloat16),
                preferred_element_type=jnp.float32)           # (128, tile_n)
    h = jnp.maximum(h + b2_ref[...], 0.0)

    # Layer 3 (128->1024): bf16 MXU matmul, f32 accumulation.
    # Bias (+ ReLU for the STN branch) is hoisted outside the kernel.
    h = jnp.dot(w3_ref[...], h.astype(jnp.bfloat16),
                preferred_element_type=jnp.float32)           # (1024, tile_n)

    # Running max over points, kept as lane-dense (1024, 128) partial maxima.
    m = acc_ref[...]
    for g in range(tile_n // 128):
        m = jnp.maximum(m, h[:, g * 128:(g + 1) * 128])
    acc_ref[...] = m

    @pl.when(nt == pl.num_programs(2) - 1)
    def _():
        o_ref[0, 0] = acc_ref[...].astype(o_ref.dtype)


def point_branch_partial_max(x_cm, w1b, w2t, b2, w3t, *, tile_n, n_split):
    """x_cm: (B, 3, n_pad) f32 channels-major, n_pad % (tile_n * n_split) == 0.
    w1b: (G, 64, 4) f32 with G in {1, B} (last column is the bias).
    w2t: (128, 64) bf16; b2: (128, 1) f32; w3t: (1024, 128) bf16.
    Returns (B, n_split, 1024, 128) f32 partial maxima."""
    B, _, n_pad = x_cm.shape
    assert n_pad % (tile_n * n_split) == 0
    tps = n_pad // (tile_n * n_split)                 # tiles per split

    c2 = w2t.shape[0]
    c3 = w3t.shape[0]
    per_batch_w1 = w1b.shape[0] != 1
    w1_map = (lambda b, s, t: (b, 0, 0)) if per_batch_w1 else (lambda b, s, t: (0, 0, 0))

    kernel = functools.partial(_point_branch_kernel, tile_n=tile_n)
    out = pl.pallas_call(
        kernel,
        out_shape=jax.ShapeDtypeStruct((B, n_split, c3, 128), jnp.float32),
        grid=(B, n_split, tps),
        in_specs=[
            pl.BlockSpec((1, 3, tile_n), lambda b, s, t: (b, 0, s * tps + t)),
            pl.BlockSpec((1, w1b.shape[1], w1b.shape[2]), w1_map),
            pl.BlockSpec((c2, w2t.shape[1]), lambda b, s, t: (0, 0)),   # resident W2^T (bf16)
            pl.BlockSpec((c2, 1), lambda b, s, t: (0, 0)),              # resident b2
            pl.BlockSpec((c3, w3t.shape[1]), lambda b, s, t: (0, 0)),   # resident W3^T (bf16)
        ],
        out_specs=pl.BlockSpec((1, 1, c3, 128), lambda b, s, t: (b, s, 0, 0)),
        scratch_shapes=[pltpu.VMEM((c3, 128), jnp.float32)],
        compiler_params=pltpu.CompilerParams(
            dimension_semantics=("parallel", "parallel", "arbitrary"),
            vmem_limit_bytes=48 * 1024 * 1024,
        ),
    )(x_cm, w1b, w2t, b2, w3t)
    return out


# ----------------------------------------------------------------------------
# Fused STN3d FC head: fc1 -> ReLU -> fc2 -> ReLU -> fc3 (identity folded into bias)
# ----------------------------------------------------------------------------

def _stn_head_kernel(g_ref, w1_ref, b1_ref, w2_ref, b2_ref, w3_ref, b3_ref, o_ref):
    h = jnp.dot(g_ref[...], w1_ref[...], preferred_element_type=jnp.float32) + b1_ref[...]
    h = jnp.maximum(h, 0.0)
    h = jnp.dot(h, w2_ref[...], preferred_element_type=jnp.float32) + b2_ref[...]
    h = jnp.maximum(h, 0.0)
    h = jnp.dot(h, w3_ref[...], preferred_element_type=jnp.float32) + b3_ref[...]
    o_ref[...] = h.astype(o_ref.dtype)


def stn_head(g, w1, b1, w2, b2, w3, b3):
    B = g.shape[0]
    c_out = w3.shape[1]
    return pl.pallas_call(
        _stn_head_kernel,
        out_shape=jax.ShapeDtypeStruct((B, c_out), jnp.float32),
        compiler_params=pltpu.CompilerParams(vmem_limit_bytes=32 * 1024 * 1024),
    )(g, w1, b1.reshape(1, -1), w2, b2.reshape(1, -1), w3, b3.reshape(1, -1))


# ----------------------------------------------------------------------------
# Deterministic synthetic parameters with BN / bias / identity folded on host.
# ----------------------------------------------------------------------------

def init_params(key):
    keys = iter(jax.random.split(key, 64))

    def dense(cin, cout):
        w = jax.random.normal(next(keys), (cin, cout), jnp.float32) * (cin ** -0.5)
        b = 0.01 * jax.random.normal(next(keys), (cout,), jnp.float32)
        return w, b

    def bn(c, eps=1e-5):
        gamma = 1.0 + 0.1 * jax.random.normal(next(keys), (c,), jnp.float32)
        beta = 0.1 * jax.random.normal(next(keys), (c,), jnp.float32)
        mean = 0.1 * jax.random.normal(next(keys), (c,), jnp.float32)
        var = 0.9 + 0.2 * jax.random.uniform(next(keys), (c,), jnp.float32)
        scale = gamma / jnp.sqrt(var + eps)
        shift = beta - mean * scale
        return scale, shift

    def fused(cin, cout):
        # conv/linear with eval-mode BatchNorm folded: w' = w*s, b' = b*s + t
        w, b = dense(cin, cout)
        s, t = bn(cout)
        return w * s[None, :], b * s + t

    def branch():
        d = {}
        d["w1"], d["b1"] = fused(3, 64)
        d["w2"], d["b2"] = fused(64, 128)
        d["w3"], d["b3"] = fused(128, 1024)
        # kernel-layout constants: transposed, bf16 for the two MXU matmuls
        d["w2t_bf16"] = d["w2"].T.astype(jnp.bfloat16)    # (128, 64)
        d["w3t_bf16"] = d["w3"].T.astype(jnp.bfloat16)    # (1024, 128)
        return d

    stn = branch()
    stn["fw1"], stn["fb1"] = fused(1024, 512)
    stn["fw2"], stn["fb2"] = fused(512, 256)
    fw3, fb3 = dense(256, 9)
    stn["fw3"] = fw3
    stn["fb3"] = fb3 + jnp.eye(3, dtype=jnp.float32).reshape(9)   # identity folded in

    feat = branch()
    return {"stn": stn, "feat": feat}


# ----------------------------------------------------------------------------
# PointNetfeat.forward (global_feat=True, feature_transform=False)
# ----------------------------------------------------------------------------

def pointnetfeat_forward(x_bcn, params, *, tile_max=2048, n_split=None):
    """x_bcn: (B, 3, N) f32 (PyTorch NCW layout). Returns (x, trans, trans_feat)."""
    B, C, N = x_bcn.shape
    assert C == 3
    x = x_bcn.astype(jnp.float32)                      # stay channels-major: no transpose

    if n_split is None:
        n_split = 1 if B % 2 == 0 else 2               # keep both v7x cores busy for odd/1 B

    # Lane-aligned point tiles sized to (nearly) minimize padding.
    tile_max = max(128, _round_up(tile_max, 128))
    k = _round_up(max(_cdiv(N, tile_max), 1), n_split)
    tn = _round_up(_cdiv(N, k), 128)
    n_pad = k * tn
    if n_pad != N:
        # repeat the last point: duplicates can never change the global max -> exact
        x = jnp.pad(x, ((0, 0), (0, 0), (0, n_pad - N)), mode="edge")

    s = params["stn"]
    f = params["feat"]

    # ---- STN3d point branch (shared W1; b1 folded in as a 4th weight column) ----
    w1b_stn = jnp.concatenate([s["w1"].T, s["b1"][:, None]], axis=1)[None]   # (1, 64, 4)
    part = point_branch_partial_max(x, w1b_stn, s["w2t_bf16"], s["b2"][:, None],
                                    s["w3t_bf16"], tile_n=tn, n_split=n_split)
    g = jnp.max(part, axis=(1, 3))                     # (B, 1024)
    g = jnp.maximum(g + s["b3"], 0.0)                  # hoisted conv3 bias + ReLU

    # ---- STN3d FC head ----
    t9 = stn_head(g, s["fw1"], s["fb1"], s["fw2"], s["fb2"], s["fw3"], s["fb3"])
    trans = t9.reshape(B, 3, 3)

    # ---- PointNetfeat point branch: fold torch.bmm(x^T, trans) into conv1 ----
    # channels-major: h1 = W1 @ trans^T @ x  =>  W1_eff[b] = W1 @ trans[b]^T
    c1 = f["b1"].shape[0]
    w1eff = jnp.einsum("bij,jc->bci", trans, f["w1"])                        # (B, 64, 3)
    b1col = jnp.broadcast_to(f["b1"][None, :, None], (B, c1, 1))
    w1b_feat = jnp.concatenate([w1eff, b1col], axis=2)                       # (B, 64, 4)
    part = point_branch_partial_max(x, w1b_feat, f["w2t_bf16"], f["b2"][:, None],
                                    f["w3t_bf16"], tile_n=tn, n_split=n_split)
    gfeat = jnp.max(part, axis=(1, 3)) + f["b3"]       # hoisted conv3/BN3 bias (no ReLU)

    trans_feat = None                                  # feature_transform=False
    return gfeat, trans, trans_feat


# ----------------------------------------------------------------------------
# Pure-JAX reference (same folded params, same bf16 quantization) for checking.
# ----------------------------------------------------------------------------

def reference_forward(x_bcn, params):
    B = x_bcn.shape[0]
    x = jnp.transpose(x_bcn, (0, 2, 1)).astype(jnp.float32)   # (B, N, 3) points-major

    def branch(xp, d):
        h = jnp.maximum(xp @ d["w1"] + d["b1"], 0.0)
        h = jnp.dot(h.astype(jnp.bfloat16), d["w2t_bf16"].T,
                    preferred_element_type=jnp.float32) + d["b2"]
        h = jnp.maximum(h, 0.0)
        h = jnp.dot(h.astype(jnp.bfloat16), d["w3t_bf16"].T,
                    preferred_element_type=jnp.float32)
        return jnp.max(h, axis=1) + d["b3"]

    s = params["stn"]
    f = params["feat"]
    g = jnp.maximum(branch(x, s), 0.0)
    g = jnp.maximum(g @ s["fw1"] + s["fb1"], 0.0)
    g = jnp.maximum(g @ s["fw2"] + s["fb2"], 0.0)
    trans = (g @ s["fw3"] + s["fb3"]).reshape(B, 3, 3)
    xt = jnp.einsum("bnc,bcd->bnd", x, trans)
    gfeat = branch(xt, f)
    return gfeat, trans


# ----------------------------------------------------------------------------
# Main
# ----------------------------------------------------------------------------

if __name__ == "__main__":
    B, N_PTS = 3, 300   # odd B -> n_split=2; N not tile-aligned -> edge-pad path

    x = jax.random.normal(jax.random.PRNGKey(0), (B, 3, N_PTS), jnp.float32)
    params = init_params(jax.random.PRNGKey(42))

    # small tile_max so the multi-tile running max, the n_split partial-max combine,
    # and the edge-padding path are all exercised at toy size
    out = pointnetfeat_forward(x, params, tile_max=128)
    out = jax.block_until_ready(out)
    gfeat, trans, trans_feat = out

    assert gfeat.shape == (B, 1024)
    assert trans.shape == (B, 3, 3)
    assert trans_feat is None
    assert bool(jnp.all(jnp.isfinite(gfeat)))
    assert bool(jnp.all(jnp.isfinite(trans)))

    ref_g, ref_t = reference_forward(x, params)
    assert bool(jnp.allclose(trans, ref_t, rtol=2e-2, atol=2e-2))
    assert bool(jnp.allclose(gfeat, ref_g, rtol=2e-2, atol=2e-2))

    print("KERNEL_OK")
</pallas_src>

<mosaic_0001>
module attributes {stable_mosaic.version = 11 : i64} {
  func.func @_point_branch_kernel(%arg0: i32, %arg1: i32, %arg2: i32, %arg3: memref<1x3x128xf32, #tpu.memory_space<vmem>>, %arg4: memref<1x64x4xf32, #tpu.memory_space<vmem>>, %arg5: memref<128x64xbf16, #tpu.memory_space<vmem>>, %arg6: memref<128x1xf32, #tpu.memory_space<vmem>>, %arg7: memref<1024x128xbf16, #tpu.memory_space<vmem>>, %arg8: memref<1x1x1024x128xf32, #tpu.memory_space<vmem>>, %arg9: memref<1024x128xf32, #tpu.memory_space<vmem>>) attributes {dimension_semantics = [#tpu.dimension_semantics<parallel>, #tpu.dimension_semantics<parallel>, #tpu.dimension_semantics<arbitrary>], iteration_bounds = array<i64: 3, 2, 2>, scalar_prefetch = 0 : i64, scratch_operands = 1 : i64, tpu.core_type = #tpu.core_type<tc>, window_params = [{transform_indices = @transform_0, window_bounds = array<i64: 1, 3, 128>}, {pipeline_mode = #tpu.pipeline_mode<synchronous>, transform_indices = @transform_1, window_bounds = array<i64: 1, 64, 4>}, {pipeline_mode = #tpu.pipeline_mode<synchronous>, transform_indices = @transform_2, window_bounds = array<i64: 128, 64>}, {pipeline_mode = #tpu.pipeline_mode<synchronous>, transform_indices = @transform_3, window_bounds = array<i64: 128, 1>}, {pipeline_mode = #tpu.pipeline_mode<synchronous>, transform_indices = @transform_4, window_bounds = array<i64: 1024, 128>}, {transform_indices = @transform_5, window_bounds = array<i64: 1, 1, 1024, 128>}]} {
    %c0_i32 = arith.constant 0 : i32
    %0 = arith.cmpi eq, %arg2, %c0_i32 : i32
    %1 = arith.extui %0 : i1 to i32
    %c0_i32_0 = arith.constant 0 : i32
    %2 = arith.cmpi ne, %1, %c0_i32_0 : i32
    scf.if %2 {
      %cst_20 = arith.constant 0xFF800000 : f32
      %46 = vector.broadcast %cst_20 : f32 to vector<1024x128xf32>
      %c0_21 = arith.constant 0 : index
      %c0_22 = arith.constant 0 : index
      %47 = vector.load %arg9[%c0_21, %c0_22] : memref<1024x128xf32, #tpu.memory_space<vmem>>, vector<1024x128xf32>
      tpu.vector_store %arg9[%c0_21, %c0_22], %46 {strides = array<i32>} : memref<1024x128xf32, #tpu.memory_space<vmem>>, vector<1024x128xf32>,
    } else {
    }
    %c0 = arith.constant 0 : index
    %c0_1 = arith.constant 0 : index
    %c0_2 = arith.constant 0 : index
    %3 = vector.load %arg3[%c0, %c0_1, %c0_2] : memref<1x3x128xf32, #tpu.memory_space<vmem>>, vector<1x3x128xf32>
    %4 = vector.shape_cast %3 : vector<1x3x128xf32> to vector<3x128xf32>
    %c0_3 = arith.constant 0 : index
    %c0_4 = arith.constant 0 : index
    %c0_5 = arith.constant 0 : index
    %5 = vector.load %arg4[%c0_3, %c0_4, %c0_5] : memref<1x64x4xf32, #tpu.memory_space<vmem>>, vector<1x64x4xf32>
    %6 = vector.shape_cast %5 : vector<1x64x4xf32> to vector<64x4xf32>
    %7 = vector.extract_strided_slice %6 {offsets = [0, 0], sizes = [64, 1], strides = [1, 1]} : vector<64x4xf32> to vector<64x1xf32>
    %8 = vector.extract_strided_slice %4 {offsets = [0, 0], sizes = [1, 128], strides = [1, 1]} : vector<3x128xf32> to vector<1x128xf32>
    %9 = vector.broadcast %7 : vector<64x1xf32> to vector<64x128xf32>
    %10 = vector.broadcast %8 : vector<1x128xf32> to vector<64x128xf32>
    %11 = arith.mulf %9, %10 : vector<64x128xf32>
    %12 = vector.extract_strided_slice %6 {offsets = [0, 1], sizes = [64, 1], strides = [1, 1]} : vector<64x4xf32> to vector<64x1xf32>
    %13 = vector.extract_strided_slice %4 {offsets = [1, 0], sizes = [1, 128], strides = [1, 1]} : vector<3x128xf32> to vector<1x128xf32>
    %14 = vector.broadcast %12 : vector<64x1xf32> to vector<64x128xf32>
    %15 = vector.broadcast %13 : vector<1x128xf32> to vector<64x128xf32>
    %16 = arith.mulf %14, %15 : vector<64x128xf32>
    %17 = arith.addf %11, %16 : vector<64x128xf32>
    %18 = vector.extract_strided_slice %6 {offsets = [0, 2], sizes = [64, 1], strides = [1, 1]} : vector<64x4xf32> to vector<64x1xf32>
    %19 = vector.extract_strided_slice %4 {offsets = [2, 0], sizes = [1, 128], strides = [1, 1]} : vector<3x128xf32> to vector<1x128xf32>
    %20 = vector.broadcast %18 : vector<64x1xf32> to vector<64x128xf32>
    %21 = vector.broadcast %19 : vector<1x128xf32> to vector<64x128xf32>
    %22 = arith.mulf %20, %21 : vector<64x128xf32>
    %23 = arith.addf %17, %22 : vector<64x128xf32>
    %24 = vector.extract_strided_slice %6 {offsets = [0, 3], sizes = [64, 1], strides = [1, 1]} : vector<64x4xf32> to vector<64x1xf32>
    %25 = vector.broadcast %24 : vector<64x1xf32> to vector<64x128xf32>
    %26 = arith.addf %23, %25 : vector<64x128xf32>
    %cst = arith.constant 0.000000e+00 : f32
    %27 = vector.broadcast %cst : f32 to vector<64x128xf32>
    %28 = arith.maximumf %26, %27 : vector<64x128xf32>
    %c0_6 = arith.constant 0 : index
    %c0_7 = arith.constant 0 : index
    %29 = vector.load %arg5[%c0_6, %c0_7] : memref<128x64xbf16, #tpu.memory_space<vmem>>, vector<128x64xbf16>
    %30 = arith.truncf %28 : vector<64x128xf32> to vector<64x128xbf16>
    %cst_8 = arith.constant dense<0.000000e+00> : vector<128x128xf32>
    %31 = tpu.matmul %29, %30, %cst_8 {dimension_numbers = #tpu.dot_dimension_numbers<[1], [0], [0], [1], [0, 0, 1, 1], [], []>} : vector<128x64xbf16>, vector<64x128xbf16>, vector<128x128xf32> -> vector<128x128xf32>
    %c0_9 = arith.constant 0 : index
    %c0_10 = arith.constant 0 : index
    %32 = vector.load %arg6[%c0_9, %c0_10] : memref<128x1xf32, #tpu.memory_space<vmem>>, vector<128x1xf32>
    %33 = vector.broadcast %32 : vector<128x1xf32> to vector<128x128xf32>
    %34 = arith.addf %31, %33 : vector<128x128xf32>
    %cst_11 = arith.constant 0.000000e+00 : f32
    %35 = vector.broadcast %cst_11 : f32 to vector<128x128xf32>
    %36 = arith.maximumf %34, %35 : vector<128x128xf32>
    %c0_12 = arith.constant 0 : index
    %c0_13 = arith.constant 0 : index
    %37 = vector.load %arg7[%c0_12, %c0_13] : memref<1024x128xbf16, #tpu.memory_space<vmem>>, vector<1024x128xbf16>
    %38 = arith.truncf %36 : vector<128x128xf32> to vector<128x128xbf16>
    %cst_14 = arith.constant dense<0.000000e+00> : vector<1024x128xf32>
    %39 = tpu.matmul %37, %38, %cst_14 {dimension_numbers = #tpu.dot_dimension_numbers<[1], [0], [0], [1], [0, 0, 1, 1], [], []>} : vector<1024x128xbf16>, vector<128x128xbf16>, vector<1024x128xf32> -> vector<1024x128xf32>
    %c0_15 = arith.constant 0 : index
    %c0_16 = arith.constant 0 : index
    %40 = vector.load %arg9[%c0_15, %c0_16] : memref<1024x128xf32, #tpu.memory_space<vmem>>, vector<1024x128xf32>
    %41 = arith.maximumf %40, %39 : vector<1024x128xf32>
    %c0_17 = arith.constant 0 : index
    %c0_18 = arith.constant 0 : index
    %42 = vector.load %arg9[%c0_17, %c0_18] : memref<1024x128xf32, #tpu.memory_space<vmem>>, vector<1024x128xf32>
    tpu.vector_store %arg9[%c0_17, %c0_18], %41 {strides = array<i32>} : memref<1024x128xf32, #tpu.memory_space<vmem>>, vector<1024x128xf32>,
    %c1_i32 = arith.constant 1 : i32
    %43 = arith.cmpi eq, %arg2, %c1_i32 : i32
    %44 = arith.extui %43 : i1 to i32
    %c0_i32_19 = arith.constant 0 : i32
    %45 = arith.cmpi ne, %44, %c0_i32_19 : i32
    scf.if %45 {
      %c0_20 = arith.constant 0 : index
      %c0_21 = arith.constant 0 : index
      %46 = vector.load %arg9[%c0_20, %c0_21] : memref<1024x128xf32, #tpu.memory_space<vmem>>, vector<1024x128xf32>
      %c0_22 = arith.constant 0 : index
      %c0_23 = arith.constant 0 : index
      %c0_24 = arith.constant 0 : index
      %c0_25 = arith.constant 0 : index
      %47 = vector.load %arg8[%c0_22, %c0_23, %c0_24, %c0_25] : memref<1x1x1024x128xf32, #tpu.memory_space<vmem>>, vector<1x1x1024x128xf32>
      %48 = vector.shape_cast %47 : vector<1x1x1024x128xf32> to vector<1024x128xf32>
      %49 = vector.shape_cast %46 : vector<1024x128xf32> to vector<1x1x1024x128xf32>
      tpu.vector_store %arg8[%c0_22, %c0_23, %c0_24, %c0_25], %49 {strides = array<i32>} : memref<1x1x1024x128xf32, #tpu.memory_space<vmem>>, vector<1x1x1024x128xf32>,
    } else {
    }
    return
  }
  func.func @transform_0(%arg0: i32, %arg1: i32, %arg2: i32) -> (i32, i32, i32) {
    %c2_i32 = arith.constant 2 : i32
    %0 = arith.muli %arg1, %c2_i32 : i32
    %1 = arith.addi %0, %arg2 : i32
    %c0_i32 = arith.constant 0 : i32
    %c0_i32_0 = arith.constant 0 : i32
    return %arg0, %c0_i32, %1 : i32, i32, i32
  }
  func.func @transform_1(%arg0: i32, %arg1: i32, %arg2: i32) -> (i32, i32, i32) {
    %c0_i32 = arith.constant 0 : i32
    %c0_i32_0 = arith.constant 0 : i32
    %c0_i32_1 = arith.constant 0 : i32
    %c0_i32_2 = arith.constant 0 : i32
    return %c0_i32, %c0_i32_0, %c0_i32_1 : i32, i32, i32
  }
  func.func @transform_2(%arg0: i32, %arg1: i32, %arg2: i32) -> (i32, i32) {
    %c0_i32 = arith.constant 0 : i32
    %c0_i32_0 = arith.constant 0 : i32
    %c0_i32_1 = arith.constant 0 : i32
    return %c0_i32, %c0_i32_0 : i32, i32
  }
  func.func @transform_3(%arg0: i32, %arg1: i32, %arg2: i32) -> (i32, i32) {
    %c0_i32 = arith.constant 0 : i32
    %c0_i32_0 = arith.constant 0 : i32
    %c0_i32_1 = arith.constant 0 : i32
    return %c0_i32, %c0_i32_0 : i32, i32
  }
  func.func @transform_4(%arg0: i32, %arg1: i32, %arg2: i32) -> (i32, i32) {
    %c0_i32 = arith.constant 0 : i32
    %c0_i32_0 = arith.constant 0 : i32
    %c0_i32_1 = arith.constant 0 : i32
    return %c0_i32, %c0_i32_0 : i32, i32
  }
  func.func @transform_5(%arg0: i32, %arg1: i32, %arg2: i32) -> (i32, i32, i32, i32) {
    %c0_i32 = arith.constant 0 : i32
    %c0_i32_0 = arith.constant 0 : i32
    %c0_i32_1 = arith.constant 0 : i32
    return %arg0, %arg1, %c0_i32, %c0_i32_0 : i32, i32, i32, i32
  }
}

</mosaic_0001>

<bundles_post_ra>
// kernel: tpu_custom_call.1
= control target key start
LH: loop header
LB: loop body
LE: loop exit
PB: predicated region body
PF: predicated region fallthrough
CT: control target
= control target key end

     0   :  { %s4302_s0 = inlined_call_operand.hbm [shape: f32[3,3,512], index: 0, kind: input, shape index: {}]   ;;  %s4303_s1 = inlined_call_operand.vmem [shape: f32[1,64,4], index: 1, kind: input, shape index: {}]   ;;  %s4304_s2 = inlined_call_operand.vmem [shape: bf16[128,64], index: 2, kind: input, shape index: {}]   ;;  %s4305_s3 = inlined_call_operand.vmem [shape: f32[128,1], index: 3, kind: input, shape index: {}]   ;;  %s4306_s4 = inlined_call_operand.hbm [shape: bf16[1024,128], index: 4, kind: input, shape index: {}]   ;;  %s4307_s5 = inlined_call_operand.hbm [shape: f32[3,2,1024,128], index: 5, kind: output, shape index: {}]  }
   0x1   :  { %4324 = sst [smem:[#allocation21_spill]] %s4303_s1 }
   0x2   :  { %4325 = sst [smem:[#allocation22_spill]] %s4304_s2 }
   0x3   :  { %4326 = sst [smem:[#allocation23_spill]] %s4305_s3 }
   0x4   :  { %4327 = sst [smem:[#allocation24_spill]] %s4306_s4 }
   0x5   :  { %4328 = sst [smem:[#allocation25_spill]] %s4307_s5 }
   0x6   :  { %10 = vsyncpa [#allocation4], 0 }
   0x7   :  { %12 = vsyncpa [#allocation4 + $0x1], 0 }
   0x8   :  { %13 = vsyncpa [#allocation7], 0 }
   0x9   :  { %14 = vsyncpa [#allocation5], 0 }
   0xa   :  { %16 = vsyncpa [#allocation5 + $0x1], 0  ;;  %s3606_s18 = smov 0   ;;  %s3608_s19 = smov 0  }
   0xb   :  { %s3610_s20 = smov 0   ;;  %s3612_s21 = smov 0  }
   0xc   :  { %s3614_s22 = smov 0   ;;  %s3616_s23 = smov 0  }
   0xd   :  { %s3618_s24 = smov 0   ;;  %s3620_s25 = smov 0  }
   0xe   :  { %s3622_s26 = smov 0   ;;  %s3624_s27 = smov 0  }
   0xf   :  { %s3626_s28 = smov 0   ;;  %s3628_s29 = smov 0  }
  0x10   :  { %s3630_s30 = smov 0  }
  0x11 LB: > { %4329 = sst [smem:[#allocation12_spill]] %s3514_s18  ;;  %s2760_s6 = sadd.s32 4294967295, %s3562_s30   ;;  %s3562_s30 = sphi %s3630_s30, %s22_s30   ;;  %s3558_s29 = sphi %s3628_s29, %s4378_s29   ;;  %s3554_s28 = sphi %s3626_s28, %s4377_s28   ;;  %s3550_s27 = sphi %s3624_s27, %s4366_s27   ;;  %s3546_s26 = sphi %s3622_s26, %s4376_s26   ;;  %s3542_s25 = sphi %s3620_s25, %s4375_s25   ;;  %s3538_s24 = sphi %s3618_s24, %s4374_s24   ;;  %s3534_s23 = sphi %s3616_s23, %s4373_s23   ;;  %s3530_s22 = sphi %s3614_s22, %s4372_s22   ;;  %s3526_s21 = sphi %s3612_s21, %s4371_s21   ;;  %s3522_s20 = sphi %s3610_s20, %s4370_s20   ;;  %s3518_s19 = sphi %s3608_s19, %s4369_s19   ;;  %s3514_s18 = sphi %s3606_s18, %s4368_s18  }
  0x12   : > { %4330 = sst [smem:[#allocation13_spill]] %s3538_s24  ;;  %s2761_s7 = sadd.s32 4294967294, %s3562_s30  }
  0x13   : > { %4331 = sst [smem:[#allocation14_spill]] %s3542_s25  ;;  %p67_p0 = scmp.ne.s32.totalorder %s3530_s22, %s3526_s21 }
  0x14   : > { %4332 = sst [smem:[#allocation15_spill]] %s3546_s26  ;;  %p3672_p1 = scmp.eq.s32.totalorder %s2760_s6, 0 }
  0x15   : > { %4333 = sst [smem:[#allocation16_spill]] %s3550_s27  ;;  %p176_p2 = scmp.ne.s32.totalorder %s3522_s20, %s3518_s19 }
  0x16   : > { %s4334_s8 = scalar_select %p3672_p1, 1, 0 }
  0x17   : > { %p177_p3 = scmp.eq.s32.totalorder %s2760_s6, 11  ;;  %p3680_p4 = por %p3672_p1, %p67_p0 }
  0x18   : > { %p182_p5 = scmp.ne.s32.totalorder %s3518_s19, %s3514_s18  ;;  %p183_p7 = scmp.eq.s32.totalorder %s2761_s7, 11 }
  0x19   : > { %s4335_s9 = scalar_select %p3680_p4, 1, 0 }
  0x1a   : > { %p3686_p6 = por %p177_p3, %p176_p2  ;;  %p2764_p8 = scmp.ge.s32.totalorder %s3562_s30, 1 }
  0x1b   : > { %p190_p9 = scmp.lt.s32.totalorder %s3562_s30, 13  ;;  %p3692_p10 = por %p183_p7, %p182_p5 }
  0x1c   : > { %s4336_s10 = scalar_select %p3686_p6, 1, 0 }
  0x1d   : > { %s4338_s11 = scalar_select %p3692_p10, 1, 0 }
  0x1e   : > { %4337 = sst [smem:[#allocation17_spill]] %s4336_s10  ;;  %p3696_p11 = pnand %p2764_p8, %p190_p9 }
  0x1f   : > { %4339 = sst [smem:[#allocation18_spill]] %s4338_s11  ;;  %s3564_s13 = smov [#allocation6]  }
  0x20   : > { %s4340_s12 = scalar_select %p3696_p11, 1, 0 }
  0x21   : > { %s211_s14 = sshll.u32 %s3564_s13, 4  ;;  %p3139_p12 = pneg %p3696_p11  ;;  %s212_s14 = int_to_ptr.vmem [resolvable:$true] %s211_s14 }
  0x22   : > { %s4342_s4 = sld [smem:[#allocation24_spill]] }
  0x23   : > { %p3704_p13 = pnand %p3139_p12, %p3672_p1 }
  0x25   : > { %p3364_p2 = pneg %p3704_p13 }
  0x28   : > { %s3362_s21 = scalar_lea.hbm %s4342_s4, 8192 }
  0x29   : > { %p3363_p0 = scmp.ne.s32.totalorder %s4342_s4, %s3362_s21  ;;  %p3369_p7 = scmp.lt.u32.totalorder %s3362_s21, %s4342_s4 }
  0x2b   : > { %p3365_p3 = pnand %p3364_p2, %p3363_p0 }
  0x2d   : > { %p3366_p5 = pneg %p3365_p3 }
  0x2f   : > { %p3371_p8 = pnand %p3369_p7, %p3366_p5 }
  0x31   : > { %3374 = shalt.err (!%p3371_p8)
}
  0x32   : > { %s3375_s18 = scalar_lea.vmem %s212_s14, 8192  ;;  %p3383_p6 = scmp.lt.s32.totalorder %s212_s14, %s212_s14 }
  0x33   : > { %p3376_p9 = scmp.ne.s32.totalorder %s212_s14, %s3375_s18  ;;  %p3384_p1 = scmp.lt.s32.totalorder %s3375_s18, %s3375_s18 }
  0x35   : > { %p3378_p12 = pnand %p3376_p9, %p3364_p2  ;;  %p3385_p4 = por %p3384_p1, %p3383_p6 }
  0x37   : > { %p3379_p10 = pneg %p3378_p12 }
  0x39   : > { %p3386_p11 = pnand %p3385_p4, %p3379_p10 }
  0x3b   : > { %3389 = shalt.err (!%p3386_p11)
}
  0x3c   : > { %s3565_s16 = smov 64   ;;  %s3566_s11 = smov 4  }
  0x3d   : > { %3142 = dma.hbm_to_vmem [thread:$0]  (!%p3704_p13), %s4342_s4, 8192, %s212_s14, [#allocation7], %s3565_s16, %s3565_s16, %s3566_s11  }
  0x3e   : > { %s34_s21 = sadd.s32 1, %s3550_s27  ;;  %s37_s6 = sadd.s32 1, %s3554_s28 }
  0x3f   : > { %p35_p1 = scmp.ge.s32.totalorder %s34_s21, 2  ;;  %s41_s7 = sadd.s32 1, %s3558_s29 }
  0x40   : > { %s2762_s13 = sshll.u32 %s3554_s28, 1  ;;  %s54_s5 = sadd.s32 1, %s3534_s23 }
  0x41   : > { %s4380_s21 = smov (%p35_p1, %s34_s21), 0  ;;  %s4382_s6 = smov (!%p35_p1, %s37_s6), %s3554_s28 }
  0x42   : > { %4343 = sst [smem:[#allocation19_spill]] %s4380_s21  ;;  %s46_s10 = sadd.s32 %s3550_s27, %s2762_s13 }
  0x43   : > { %p61_p4 = scmp.ne.s32.totalorder %s3534_s23, %s3530_s22  ;;  %p39_p6 = scmp.ge.s32.totalorder %s4382_s6, 2 }
  0x44   : > { %p62_p10 = scmp.eq.s32.totalorder %s3562_s30, 0  ;;  %s166_s14 = sadd.s32 1, %s3522_s20 }
  0x45   : > { %p3152_p11 = scmp.lt.s32.totalorder %s3562_s30, 12  ;;  %s4384_s6 = smov (%p39_p6, %s4382_s6), 0 }
  0x46   : > { %4344 = sst [smem:[#allocation20_spill]] %s4384_s6  ;;  %s4386_s7 = smov (!%p39_p6, %s41_s7), %s3558_s29 }
  0x47   : > { %s2763_s15 = sshll.u32 %s4384_s6, 1  ;;  %p3742_p13 = por %p62_p10, %p61_p4 }
  0x48   : > { %p43_p0 = scmp.ge.s32.totalorder %s4386_s7, 3  ;;  %s48_s11 = sadd.s32 %s2763_s15, %s4380_s21 }
  0x49   : > { %s50_s18 = ssub.s32 %s46_s10, %s48_s11  ;;  %s162_s17 = ssub.s32 %s3554_s28, %s4384_s6 }
  0x4a   : > { %s4388_s7 = smov (%p43_p0, %s4386_s7), 0  ;;  %s225_s13 = sand.u32 1, %s3534_s23  }
  0x4b   : > { %s2769_s4 = sshll.u32 %s3558_s29, 2  ;;  %s49_s27 = ssub.s32 %s3558_s29, %s4388_s7 }
  0x4c   : > { %s51_s26 = sor.u32 %s50_s18, %s49_s27  ;;  %s163_s25 = sor.u32 %s162_s17, %s49_s27 }
  0x4d   : > { %p52_p2 = scmp.eq.s32.totalorder %s51_s26, 0  ;;  %p164_p3 = scmp.eq.s32.totalorder %s163_s25, 0 }
  0x4e   : > { %s2767_s3 = sshll.u32 %s225_s13, 2  ;;  %s236_s2 = sadd.s32 %s2769_s4, %s46_s10 }
  0x4f   : > { %s3756_s1 = scalar_select %p52_p2, %s3534_s23, %s54_s5  }
  0x50   : > { %s3759_s24 = scalar_select %p164_p3, %s3522_s20, %s166_s14  }
  0x51   : > { %s2770_s15 = sshll.u32 %s236_s2, 6  ;;  %s229_s18 = scalar_lea.vmem [#allocation3], %s2767_s3 }
  0x52   : > { %s3764_s21 = scalar_lea.hbm %s4302_s0, %s2770_s15  ;;  %s240_s27 = sshll.u32 %s229_s18, 4  ;;  %s3766_s27 = int_to_ptr.vmem [resolvable:$true] %s240_s27 }
  0x53   : > { %p3772_p5 = pnand %p3152_p11, %p3742_p13  ;;  %s226_s2 = scalar_lea.sflag [#allocation4], %s225_s13 }
  0x54   : > { %s3390_s5 = scalar_lea.hbm %s3764_s21, 64  ;;  %s3395_s26 = scalar_lea.hbm %s4302_s0, 768 }
  0x55   : > { %p3391_p7 = scmp.ne.s32.totalorder %s3764_s21, %s3390_s5  ;;  %p3392_p8 = pneg %p3772_p5 }
  0x56   : > { %p3396_p1 = scmp.lt.u32.totalorder %s3764_s21, %s4302_s0  ;;  %p3397_p4 = scmp.lt.u32.totalorder %s3395_s26, %s3390_s5 }
  0x57   : > { %p3393_p9 = pnand %p3392_p8, %p3391_p7  ;;  %p3399_p10 = scmp.lt.u32.totalorder %s3390_s5, %s3764_s21 }
  0x58   : > { %p3398_p6 = por %p3397_p4, %p3396_p1 }
  0x59   : > { %p3394_p12 = pneg %p3393_p9 }
  0x5a   : > { %p3400_p11 = por %p3399_p10, %p3398_p6 }
  0x5c   : > { %p3401_p13 = pnand %p3400_p11, %p3394_p12 }
  0x5e   : > { %3404 = shalt.err (!%p3401_p13)
}
  0x5f   : > { %s3405_s14 = scalar_lea.vmem %s3766_s27, 64  ;;  %s3567_s16 = smov [#allocation3]  }
  0x60   : > { %p3406_p0 = scmp.ne.s32.totalorder %s3766_s27, %s3405_s14  ;;  %s3410_s17 = sshll.u32 %s3567_s16, 4  ;;  %s3411_s17 = int_to_ptr.vmem [resolvable:$false] %s3410_s17 }
  0x61   : > { %s3412_s13 = scalar_lea.vmem %s3411_s17, 128  ;;  %p3413_p7 = scmp.lt.s32.totalorder %s3766_s27, %s3411_s17 }
  0x62   : > { %p3408_p2 = pnand %p3406_p0, %p3392_p8  ;;  %p3414_p9 = scmp.lt.s32.totalorder %s3412_s13, %s3405_s14 }
  0x64   : > { %p3409_p3 = pneg %p3408_p2  ;;  %p3415_p1 = por %p3414_p9, %p3413_p7 }
  0x66   : > { %p3416_p4 = pnand %p3415_p1, %p3409_p3 }
  0x68   : > { %3419 = shalt.err (!%p3416_p4)
}
  0x69   : > { %3146 = dma.hbm_to_vmem [thread:$0]  (!%p3772_p5), %s3764_s21, 64, %s3766_s27, %s226_s2  }
  0x6a   : > { %p4347_p12 = scmp.ne.s32.totalorder %s4340_s12, 0 }
  0x6b   : > { %s251_s15 = sand.u32 (!%p4347_p12), 1, %s3530_s22   ;;  %p4348_p8 = scmp.ne.s32.totalorder (!%p4347_p12), %s4335_s9, 0 }
  0x6c   : > { %249 = sbr.rel (%p4347_p12) target bundleno = 1102 (0x44e), region = 40  ;;  %s3804_s11 = sshll.u32 (!%p4347_p12), %s251_s15, 2 }
  0x6d   : > { %s252_s18 = scalar_lea.sflag (!%p4347_p12), [#allocation4], %s251_s15  ;;  %s255_s5 = scalar_lea.vmem (!%p4347_p12), [#allocation3], %s3804_s11 }
  0x73   : > { %3501 = dma.done.wait (%p4348_p8), %s252_s18, 64  }
  0x74   : > { %3503 = vsyncadd (%p4348_p8), %s252_s18, 4294967232  ;;  %p4349_p6 = scmp.ne.s32.totalorder %s4334_s8, 0 }
  0x76   : > { %3505 = dma.done.wait (%p4349_p6), [#allocation7], 8192  }
  0x77   : > { %3507 = vsyncadd (%p4349_p6), [#allocation7], 4294959104  ;;  %s283_s12 = sand.u32 1, %s3518_s19   ;;  %s4350_s4 = sld [smem:[#allocation13_spill]] }
  0x78   : > { %s2774_s21 = sshll.u32 %s283_s12, 10 }
  0x79   : > { %s3818_s27 = scalar_lea.vmem [#allocation8], %s2774_s21 }
  0x7d   : > { %p2775_p5 = scmp.ne.s32.totalorder %s4350_s4, 0 }
  0x7e   : > { %v3568_v0 = vmov (!%p2775_p5), -inf  }
  0x7f   : > { %292 = sbr.rel (%p2775_p5) target bundleno = 191 (0xbf), region = 52  ;;  %293 = vst [vmem:[#allocation2] sm:$0xff] (!%p2775_p5), %v3568_v0  ;;  %294 = vst [vmem:[#allocation2 + $0x8] sm:$0xff] (!%p2775_p5), %v3568_v0 }
  0x80   : > { %295 = vst [vmem:[#allocation2 + $0x10] sm:$0xff] (!%p2775_p5), %v3568_v0  ;;  %296 = vst [vmem:[#allocation2 + $0x18] sm:$0xff] (!%p2775_p5), %v3568_v0 }
  0x81   : > { %297 = vst [vmem:[#allocation2 + $0x20] sm:$0xff] (!%p2775_p5), %v3568_v0  ;;  %298 = vst [vmem:[#allocation2 + $0x28] sm:$0xff] (!%p2775_p5), %v3568_v0 }
  0x82   : > { %299 = vst [vmem:[#allocation2 + $0x30] sm:$0xff] (!%p2775_p5), %v3568_v0  ;;  %300 = vst [vmem:[#allocation2 + $0x38] sm:$0xff] (!%p2775_p5), %v3568_v0 }
  0x83   : > { %301 = vst [vmem:[#allocation2 + $0x40] sm:$0xff] (!%p2775_p5), %v3568_v0  ;;  %302 = vst [vmem:[#allocation2 + $0x48] sm:$0xff] (!%p2775_p5), %v3568_v0 }
  0x84   : > { %303 = vst [vmem:[#allocation2 + $0x50] sm:$0xff] (!%p2775_p5), %v3568_v0  ;;  %304 = vst [vmem:[#allocation2 + $0x58] sm:$0xff] (!%p2775_p5), %v3568_v0 }
  0x85   : > { %305 = vst [vmem:[#allocation2 + $0x60] sm:$0xff] (!%p2775_p5), %v3568_v0  ;;  %306 = vst [vmem:[#allocation2 + $0x68] sm:$0xff] (!%p2775_p5), %v3568_v0 }
  0x86   : > { %307 = vst [vmem:[#allocation2 + $0x70] sm:$0xff] %v3568_v0  ;;  %308 = vst [vmem:[#allocation2 + $0x78] sm:$0xff] %v3568_v0 }
  0x87   : > { %309 = vst [vmem:[#allocation2 + $0x80] sm:$0xff] %v3568_v0  ;;  %310 = vst [vmem:[#allocation2 + $0x88] sm:$0xff] %v3568_v0 }
  0x88   : > { %311 = vst [vmem:[#allocation2 + $0x90] sm:$0xff] %v3568_v0  ;;  %312 = vst [vmem:[#allocation2 + $0x98] sm:$0xff] %v3568_v0 }
  0x89   : > { %313 = vst [vmem:[#allocation2 + $0xa0] sm:$0xff] %v3568_v0  ;;  %314 = vst [vmem:[#allocation2 + $0xa8] sm:$0xff] %v3568_v0 }
  0x8a   : > { %315 = vst [vmem:[#allocation2 + $0xb0] sm:$0xff] %v3568_v0  ;;  %316 = vst [vmem:[#allocation2 + $0xb8] sm:$0xff] %v3568_v0 }
  0x8b   : > { %317 = vst [vmem:[#allocation2 + $0xc0] sm:$0xff] %v3568_v0  ;;  %318 = vst [vmem:[#allocation2 + $0xc8] sm:$0xff] %v3568_v0 }
  0x8c   : > { %319 = vst [vmem:[#allocation2 + $0xd0] sm:$0xff] %v3568_v0  ;;  %320 = vst [vmem:[#allocation2 + $0xd8] sm:$0xff] %v3568_v0 }
  0x8d   : > { %321 = vst [vmem:[#allocation2 + $0xe0] sm:$0xff] %v3568_v0  ;;  %322 = vst [vmem:[#allocation2 + $0xe8] sm:$0xff] %v3568_v0 }
  0x8e   : > { %323 = vst [vmem:[#allocation2 + $0xf0] sm:$0xff] %v3568_v0  ;;  %324 = vst [vmem:[#allocation2 + $0xf8] sm:$0xff] %v3568_v0 }
  0x8f   : > { %325 = vst [vmem:[#allocation2 + $0x100] sm:$0xff] %v3568_v0  ;;  %326 = vst [vmem:[#allocation2 + $0x108] sm:$0xff] %v3568_v0 }
  0x90   : > { %327 = vst [vmem:[#allocation2 + $0x110] sm:$0xff] %v3568_v0  ;;  %328 = vst [vmem:[#allocation2 + $0x118] sm:$0xff] %v3568_v0 }
  0x91   : > { %329 = vst [vmem:[#allocation2 + $0x120] sm:$0xff] %v3568_v0  ;;  %330 = vst [vmem:[#allocation2 + $0x128] sm:$0xff] %v3568_v0 }
  0x92   : > { %331 = vst [vmem:[#allocation2 + $0x130] sm:$0xff] %v3568_v0  ;;  %332 = vst [vmem:[#allocation2 + $0x138] sm:$0xff] %v3568_v0 }
  0x93   : > { %333 = vst [vmem:[#allocation2 + $0x140] sm:$0xff] %v3568_v0  ;;  %334 = vst [vmem:[#allocation2 + $0x148] sm:$0xff] %v3568_v0 }
  0x94   : > { %335 = vst [vmem:[#allocation2 + $0x150] sm:$0xff] %v3568_v0  ;;  %336 = vst [vmem:[#allocation2 + $0x158] sm:$0xff] %v3568_v0 }
  0x95   : > { %337 = vst [vmem:[#allocation2 + $0x160] sm:$0xff] %v3568_v0  ;;  %338 = vst [vmem:[#allocation2 + $0x168] sm:$0xff] %v3568_v0 }
  0x96   : > { %339 = vst [vmem:[#allocation2 + $0x170] sm:$0xff] %v3568_v0  ;;  %340 = vst [vmem:[#allocation2 + $0x178] sm:$0xff] %v3568_v0 }
  0x97   : > { %341 = vst [vmem:[#allocation2 + $0x180] sm:$0xff] %v3568_v0  ;;  %342 = vst [vmem:[#allocation2 + $0x188] sm:$0xff] %v3568_v0 }
  0x98   : > { %343 = vst [vmem:[#allocation2 + $0x190] sm:$0xff] %v3568_v0  ;;  %344 = vst [vmem:[#allocation2 + $0x198] sm:$0xff] %v3568_v0 }
  0x99   : > { %345 = vst [vmem:[#allocation2 + $0x1a0] sm:$0xff] %v3568_v0  ;;  %346 = vst [vmem:[#allocation2 + $0x1a8] sm:$0xff] %v3568_v0 }
  0x9a   : > { %347 = vst [vmem:[#allocation2 + $0x1b0] sm:$0xff] %v3568_v0  ;;  %348 = vst [vmem:[#allocation2 + $0x1b8] sm:$0xff] %v3568_v0 }
  0x9b   : > { %349 = vst [vmem:[#allocation2 + $0x1c0] sm:$0xff] %v3568_v0  ;;  %350 = vst [vmem:[#allocation2 + $0x1c8] sm:$0xff] %v3568_v0 }
  0x9c   : > { %351 = vst [vmem:[#allocation2 + $0x1d0] sm:$0xff] %v3568_v0  ;;  %352 = vst [vmem:[#allocation2 + $0x1d8] sm:$0xff] %v3568_v0 }
  0x9d   : > { %353 = vst [vmem:[#allocation2 + $0x1e0] sm:$0xff] %v3568_v0  ;;  %354 = vst [vmem:[#allocation2 + $0x1e8] sm:$0xff] %v3568_v0 }
  0x9e   : > { %355 = vst [vmem:[#allocation2 + $0x1f0] sm:$0xff] %v3568_v0  ;;  %356 = vst [vmem:[#allocation2 + $0x1f8] sm:$0xff] %v3568_v0 }
  0x9f   : > { %357 = vst [vmem:[#allocation2 + $0x200] sm:$0xff] %v3568_v0  ;;  %358 = vst [vmem:[#allocation2 + $0x208] sm:$0xff] %v3568_v0 }
  0xa0   : > { %359 = vst [vmem:[#allocation2 + $0x210] sm:$0xff] %v3568_v0  ;;  %360 = vst [vmem:[#allocation2 + $0x218] sm:$0xff] %v3568_v0 }
  0xa1   : > { %361 = vst [vmem:[#allocation2 + $0x220] sm:$0xff] %v3568_v0  ;;  %362 = vst [vmem:[#allocation2 + $0x228] sm:$0xff] %v3568_v0 }
  0xa2   : > { %363 = vst [vmem:[#allocation2 + $0x230] sm:$0xff] %v3568_v0  ;;  %364 = vst [vmem:[#allocation2 + $0x238] sm:$0xff] %v3568_v0 }
  0xa3   : > { %365 = vst [vmem:[#allocation2 + $0x240] sm:$0xff] %v3568_v0  ;;  %366 = vst [vmem:[#allocation2 + $0x248] sm:$0xff] %v3568_v0 }
  0xa4   : > { %367 = vst [vmem:[#allocation2 + $0x250] sm:$0xff] %v3568_v0  ;;  %368 = vst [vmem:[#allocation2 + $0x258] sm:$0xff] %v3568_v0 }
  0xa5   : > { %369 = vst [vmem:[#allocation2 + $0x260] sm:$0xff] %v3568_v0  ;;  %370 = vst [vmem:[#allocation2 + $0x268] sm:$0xff] %v3568_v0 }
  0xa6   : > { %371 = vst [vmem:[#allocation2 + $0x270] sm:$0xff] %v3568_v0  ;;  %372 = vst [vmem:[#allocation2 + $0x278] sm:$0xff] %v3568_v0 }
  0xa7   : > { %373 = vst [vmem:[#allocation2 + $0x280] sm:$0xff] %v3568_v0  ;;  %374 = vst [vmem:[#allocation2 + $0x288] sm:$0xff] %v3568_v0 }
  0xa8   : > { %375 = vst [vmem:[#allocation2 + $0x290] sm:$0xff] %v3568_v0  ;;  %376 = vst [vmem:[#allocation2 + $0x298] sm:$0xff] %v3568_v0 }
  0xa9   : > { %377 = vst [vmem:[#allocation2 + $0x2a0] sm:$0xff] %v3568_v0  ;;  %378 = vst [vmem:[#allocation2 + $0x2a8] sm:$0xff] %v3568_v0 }
  0xaa   : > { %379 = vst [vmem:[#allocation2 + $0x2b0] sm:$0xff] %v3568_v0  ;;  %380 = vst [vmem:[#allocation2 + $0x2b8] sm:$0xff] %v3568_v0 }
  0xab   : > { %381 = vst [vmem:[#allocation2 + $0x2c0] sm:$0xff] %v3568_v0  ;;  %382 = vst [vmem:[#allocation2 + $0x2c8] sm:$0xff] %v3568_v0 }
  0xac   : > { %383 = vst [vmem:[#allocation2 + $0x2d0] sm:$0xff] %v3568_v0  ;;  %384 = vst [vmem:[#allocation2 + $0x2d8] sm:$0xff] %v3568_v0 }
  0xad   : > { %385 = vst [vmem:[#allocation2 + $0x2e0] sm:$0xff] %v3568_v0  ;;  %386 = vst [vmem:[#allocation2 + $0x2e8] sm:$0xff] %v3568_v0 }
  0xae   : > { %387 = vst [vmem:[#allocation2 + $0x2f0] sm:$0xff] %v3568_v0  ;;  %388 = vst [vmem:[#allocation2 + $0x2f8] sm:$0xff] %v3568_v0 }
  0xaf   : > { %389 = vst [vmem:[#allocation2 + $0x300] sm:$0xff] %v3568_v0  ;;  %390 = vst [vmem:[#allocation2 + $0x308] sm:$0xff] %v3568_v0 }
  0xb0   : > { %391 = vst [vmem:[#allocation2 + $0x310] sm:$0xff] %v3568_v0  ;;  %392 = vst [vmem:[#allocation2 + $0x318] sm:$0xff] %v3568_v0 }
  0xb1   : > { %393 = vst [vmem:[#allocation2 + $0x320] sm:$0xff] %v3568_v0  ;;  %394 = vst [vmem:[#allocation2 + $0x328] sm:$0xff] %v3568_v0 }
  0xb2   : > { %395 = vst [vmem:[#allocation2 + $0x330] sm:$0xff] %v3568_v0  ;;  %396 = vst [vmem:[#allocation2 + $0x338] sm:$0xff] %v3568_v0 }
  0xb3   : > { %397 = vst [vmem:[#allocation2 + $0x340] sm:$0xff] %v3568_v0  ;;  %398 = vst [vmem:[#allocation2 + $0x348] sm:$0xff] %v3568_v0 }
  0xb4   : > { %399 = vst [vmem:[#allocation2 + $0x350] sm:$0xff] %v3568_v0  ;;  %400 = vst [vmem:[#allocation2 + $0x358] sm:$0xff] %v3568_v0 }
  0xb5   : > { %401 = vst [vmem:[#allocation2 + $0x360] sm:$0xff] %v3568_v0  ;;  %402 = vst [vmem:[#allocation2 + $0x368] sm:$0xff] %v3568_v0 }
  0xb6   : > { %403 = vst [vmem:[#allocation2 + $0x370] sm:$0xff] %v3568_v0  ;;  %404 = vst [vmem:[#allocation2 + $0x378] sm:$0xff] %v3568_v0 }
  0xb7   : > { %405 = vst [vmem:[#allocation2 + $0x380] sm:$0xff] %v3568_v0  ;;  %406 = vst [vmem:[#allocation2 + $0x388] sm:$0xff] %v3568_v0 }
  0xb8   : > { %407 = vst [vmem:[#allocation2 + $0x390] sm:$0xff] %v3568_v0  ;;  %408 = vst [vmem:[#allocation2 + $0x398] sm:$0xff] %v3568_v0 }
  0xb9   : > { %409 = vst [vmem:[#allocation2 + $0x3a0] sm:$0xff] %v3568_v0  ;;  %410 = vst [vmem:[#allocation2 + $0x3a8] sm:$0xff] %v3568_v0 }
  0xba   : > { %411 = vst [vmem:[#allocation2 + $0x3b0] sm:$0xff] %v3568_v0  ;;  %412 = vst [vmem:[#allocation2 + $0x3b8] sm:$0xff] %v3568_v0 }
  0xbb   : > { %413 = vst [vmem:[#allocation2 + $0x3c0] sm:$0xff] %v3568_v0  ;;  %414 = vst [vmem:[#allocation2 + $0x3c8] sm:$0xff] %v3568_v0 }
  0xbc   : > { %415 = vst [vmem:[#allocation2 + $0x3d0] sm:$0xff] %v3568_v0  ;;  %416 = vst [vmem:[#allocation2 + $0x3d8] sm:$0xff] %v3568_v0 }
  0xbd   : > { %417 = vst [vmem:[#allocation2 + $0x3e0] sm:$0xff] %v3568_v0  ;;  %418 = vst [vmem:[#allocation2 + $0x3e8] sm:$0xff] %v3568_v0 }
  0xbe   : > { %419 = vst [vmem:[#allocation2 + $0x3f0] sm:$0xff] %v3568_v0  ;;  %420 = vst [vmem:[#allocation2 + $0x3f8] sm:$0xff] %v3568_v0 }
  0xbf PF: > { %s4351_s2 = sld [smem:[#allocation21_spill]]  ;;  %v3569_v3 = vmov 3   ;;  %v3570_v4 = vmov 1   ;;  %v3571_v5 = vmov 2   ;;  %v3572_v8 = vmov 0   ;;  %s4352_s25 = sld [smem:[#allocation22_spill]] }
  0xc0   : > { %3275 = vset.pattern.permute.xlu0 %v3569_v3  ;;  %3269 = vset.pattern.permute.xlu1 %v3570_v4  ;;  %vm790_vm0 = vcmask 523264   ;;  %s4354_s14 = sld [smem:[#allocation23_spill]]  ;;  %v470_v26 = vlaneseq  ;;  %v421_v38 = vld [vmem:[%s255_s5] sm:$0x7]  ;;  %s4355_s17 = sld [smem:[#allocation13_spill]] }
  0xc2   : > { %v471_v31 = vshrl.u32 %v470_v26, 7 }
  0xc4   : > { %v516_v36 = vsub.s32 1, %v471_v31  ;;  %v472_v37 = vsub.s32 0, %v471_v31  ;;  %v568_v39 = vsub.s32 2, %v471_v31 }
  0xc5   : > { %v423_v1 = vld [vmem:[%s4351_s2 + $0x8] sm:$0xff]  ;;  %v422_v2 = vld [vmem:[%s4351_s2] sm:$0xff]  ;;  %v424_v6 = vld [vmem:[%s4351_s2 + $0x10] sm:$0xff]  ;;  %s4353_s10 = smov %s4352_s25 }
  0xc6   : > { %591 = vperm.xlu0 %3275, %v423_v1   ;;  %483 = vperm.xlu1 %3269, %v422_v2   ;;  %v427_v7 = vld [vmem:[%s4351_s2 + $0x28] sm:$0xff]  ;;  %v425_v9 = vld [vmem:[%s4351_s2 + $0x18] sm:$0xff]  ;;  %v428_v10 = vld [vmem:[%s4351_s2 + $0x30] sm:$0xff]  ;;  %v4023_v44 = vrot.slane %v421_v38, %v516_v36  ;;  %v4025_v45 = vrot.slane %v421_v38, %v472_v37  ;;  %v4027_v46 = vrot.slane %v421_v38, %v568_v39  ;;  %p2856_p10 = scmp.ne.s32.totalorder %s4355_s17, 1 }
  0xc7   : > { %v426_v11 = vld [vmem:[%s4351_s2 + $0x20] sm:$0xff]  ;;  %v429_v12 = vld [vmem:[%s4351_s2 + $0x38] sm:$0xff]  ;;  %v655_v15 = vld [vmem:[%s4354_s14 + $0x8] sm:$0xff] }
  0xc8   : > { %v3290_v13 = vld [vmem:[%s4352_s25] sm:$0xff]   ;;  %v656_v16 = vld [vmem:[%s4354_s14 + $0x10] sm:$0xff]  ;;  %v657_v20 = vld [vmem:[%s4354_s14 + $0x18] sm:$0xff] }
  0xc9   : > { %2955 = vmatprep.mubr.msk.bf16.mxu0 %vm790_vm0, %v3290_v13  ;;  %v654_v14 = vld [vmem:[%s4354_s14] sm:$0xff]  ;;  %v660_v21 = vld [vmem:[%s4354_s14 + $0x30] sm:$0xff]  ;;  %v659_v24 = vld [vmem:[%s4354_s14 + $0x28] sm:$0xff] }
  0xca   : > { %3276 = vset.pattern.permute.xlu0 %v3571_v5  ;;  %487 = vperm.xlu1 %3269, %v423_v1   ;;  %v658_v17 = vld [vmem:[%s4354_s14 + $0x20] sm:$0xff]  ;;  %v661_v29 = vld [vmem:[%s4354_s14 + $0x38] sm:$0xff]  ;;  %v664_v30 = vld [vmem:[%s4354_s14 + $0x50] sm:$0xff] }
  0xcb   : > { %535 = vperm.xlu0 %3276, %v422_v2   ;;  %v662_v25 = vld [vmem:[%s4354_s14 + $0x40] sm:$0xff]  ;;  %v663_v34 = vld [vmem:[%s4354_s14 + $0x48] sm:$0xff]  ;;  %v665_v41 = vld [vmem:[%s4354_s14 + $0x58] sm:$0xff] }
  0xcc   : > { %v666_v35 = vld [vmem:[%s4354_s14 + $0x60] sm:$0xff]  ;;  %v668_v43 = vld [vmem:[%s4354_s14 + $0x70] sm:$0xff]  ;;  %v667_v48 = vld [vmem:[%s4354_s14 + $0x68] sm:$0xff] }
  0xcd   : > { %v669_v56 = vld [vmem:[%s4354_s14 + $0x78] sm:$0xff] }
  0xce   : > { %3270 = vset.pattern.permute.xlu1 %v3571_v5 }
  0xcf   : > { %543 = vperm.xlu0 %3276, %v424_v6   ;;  %539 = vperm.xlu1 %3270, %v423_v1  }
  0xd3   : > { %555 = vperm.xlu0 %3276, %v427_v7   ;;  %3271 = vset.pattern.permute.xlu1 %v3572_v8 }
  0xd4   : > { %442 = vperm.xlu1 %3271, %v424_v6  }
  0xd7   : > { %3280 = vset.pattern.permute.xlu0 %v3572_v8 }
  0xd8   : > { %432 = vperm.xlu0 %3280, %v422_v2   ;;  %3272 = vset.pattern.permute.xlu1 %v3570_v4 }
  0xd9   : > { %491 = vperm.xlu1 %3272, %v424_v6  }
  0xdc   : > { %437 = vperm.xlu0 %3280, %v423_v1  }
  0xdd   : > { %495 = vperm.xlu1 %3272, %v425_v9  }
  0xe0   : > { %447 = vperm.xlu0 %3280, %v425_v9  }
  0xe1   : > { %3273 = vset.pattern.permute.xlu1 %v3571_v5 }
  0xe2   : > { %547 = vperm.xlu1 %3273, %v425_v9  }
  0xe4   : > { %462 = vperm.xlu0 %3280, %v428_v10  }
  0xe6   : > { %3274 = vset.pattern.permute.xlu1 %v3569_v3 }
  0xe7   : > { %587 = vperm.xlu1 %3274, %v422_v2  }
  0xe8   : > { %3282 = vset.pattern.permute.xlu0 %v3570_v4 }
  0xe9   : > { %499 = vperm.xlu0 %3282, %v426_v11  }
  0xeb   : > { %3277 = vset.pattern.permute.xlu1 %v3572_v8 }
  0xec   : > { %452 = vperm.xlu1 %3277, %v426_v11  }
  0xed   : > { %511 = vperm.xlu0 %3282, %v429_v12  }
  0xf0   : > { %457 = vperm.xlu1 %3277, %v427_v7  }
  0xf1   : > { %3286 = vset.pattern.permute.xlu0 %v3569_v3 }
  0xf2   : > { %603 = vperm.xlu0 %3286, %v426_v11  }
  0xf4   : > { %3278 = vset.pattern.permute.xlu1 %v3570_v4 }
  0xf5   : > { %503 = vperm.xlu1 %3278, %v427_v7  }
  0xf6   : > { %615 = vperm.xlu0 %3286, %v429_v12  }
  0xf9   : > { %3279 = vset.pattern.permute.xlu1 %v3571_v5 }
  0xfa   : > { %551 = vperm.xlu1 %3279, %v426_v11   ;;  %3289 = vset.pattern.permute.xlu0 %v3572_v8 }
  0xfb   : > { %677 = vperm.xlu0 %3289, %v655_v15  }
  0xfe   : > { %3281 = vset.pattern.permute.xlu1 %v3569_v3 }
  0xff   : > { %595 = vperm.xlu1 %3281, %v424_v6   ;;  %692 = vperm.xlu0 %3289, %v658_v17  }
 0x103   : > { %599 = vperm.xlu1 %3281, %v425_v9   ;;  %702 = vperm.xlu0 %3289, %v660_v21  }
 0x107   : > { %3283 = vset.pattern.permute.xlu1 %v3572_v8  ;;  %712 = vperm.xlu0 %3289, %v662_v25  }
 0x108   : > { %467 = vperm.xlu1 %3283, %v429_v12  }
 0x10b   : > { %722 = vperm.xlu0 %3289, %v664_v30  }
 0x10c   : > { %3284 = vset.pattern.permute.xlu1 %v3570_v4 }
 0x10d   : > { %507 = vperm.xlu1 %3284, %v428_v10  }
 0x10f   : > { %732 = vperm.xlu0 %3289, %v666_v35  }
 0x111   : > { %3285 = vset.pattern.permute.xlu1 %v3571_v5 }
 0x112   : > { %559 = vperm.xlu1 %3285, %v428_v10  }
 0x113   : > { %742 = vperm.xlu0 %3289, %v668_v43  }
 0x116   : > { %563 = vperm.xlu1 %3285, %v429_v12  }
 0x11a   : > { %3287 = vset.pattern.permute.xlu1 %v3569_v3 }
 0x11b   : > { %607 = vperm.xlu1 %3287, %v427_v7  }
 0x11f   : > { %611 = vperm.xlu1 %3287, %v428_v10  }
 0x123   : > { %3288 = vset.pattern.permute.xlu1 %v3572_v8 }
 0x124   : > { %672 = vperm.xlu1 %3288, %v654_v14  }
 0x128   : > { %682 = vperm.xlu1 %3288, %v656_v16  }
 0x12c   : > { %687 = vperm.xlu1 %3288, %v657_v20  }
 0x130   : > { %697 = vperm.xlu1 %3288, %v659_v24  }
 0x134   : > { %707 = vperm.xlu1 %3288, %v661_v29  }
 0x138   : > { %717 = vperm.xlu1 %3288, %v663_v34  }
 0x13c   : > { %727 = vperm.xlu1 %3288, %v665_v41  }
 0x140   : > { %737 = vperm.xlu1 %3288, %v667_v48  }
 0x144   : > { %747 = vperm.xlu1 %3288, %v669_v56  }
 0x145   : > { %v484_v18 = vpop.permute.xlu1 %483  ;;  %v592_v19 = vpop.permute.xlu0 %591 }
 0x146   : > { %v518_v54 = vmul.f32 %v4023_v44, %v484_v18 }
 0x149   : > { %v488_v22 = vpop.permute.xlu1 %487 }
 0x14a   : > { %v536_v23 = vpop.permute.xlu0 %535  ;;  %v519_v49 = vmul.f32 %v4023_v44, %v488_v22 }
 0x14b   : > { %v570_v57 = vmul.f32 %v4027_v46, %v536_v23 }
 0x14e   : > { %v540_v27 = vpop.permute.xlu1 %539  ;;  %v544_v28 = vpop.permute.xlu0 %543 }
 0x14f   : > { %v571_v55 = vmul.f32 %v4027_v46, %v540_v27  ;;  %v572_v12 = vmul.f32 %v4027_v46, %v544_v28 }
 0x152   : > { %v4007_v32 = vpop.permute.xlu0 %555 }
 0x153   : > { %v443_v33 = vpop.permute.xlu1 %442 }
 0x154   : > { %v476_v9 = vmul.f32 %v4025_v45, %v443_v33 }
 0x157   : > { %v433_v40 = vpop.permute.xlu0 %432 }
 0x158   : > { %v492_v42 = vpop.permute.xlu1 %491  ;;  %v474_v52 = vmul.f32 %v4025_v45, %v433_v40 }
 0x159   : > { %v520_v8 = vmul.f32 %v4023_v44, %v492_v42 }
 0x15a   : > { %v526_v58 = vadd.f32 %v518_v54, %v474_v52 }
 0x15b   : > { %v438_v47 = vpop.permute.xlu0 %437  ;;  %v528_v13 = vadd.f32 %v520_v8, %v476_v9  ;;  %v3296_v8 = vld [vmem:[%s4353_s10 + $0x30] sm:$0xff]   ;;  %v3297_v9 = vld [vmem:[%s4353_s10 + $0x38] sm:$0xff]  }
 0x15c   : > { %v475_v50 = vmul.f32 %v4025_v45, %v438_v47  ;;  %v496_v51 = vpop.permute.xlu1 %495  ;;  %v578_v61 = vadd.f32 %v570_v57, %v526_v58 }
 0x15d   : > { %v521_v14 = vmul.f32 %v4023_v44, %v496_v51  ;;  %v580_v18 = vadd.f32 %v572_v12, %v528_v13 }
 0x15e   : > { %v527_v53 = vadd.f32 %v519_v49, %v475_v50  ;;  %v575_v49 = vmul.f32 %v4027_v46, %v4007_v32 }
 0x15f   : > { %v448_v7 = vpop.permute.xlu0 %447 }
 0x160   : > { %v579_v59 = vadd.f32 %v571_v55, %v527_v53  ;;  %v477_v10 = vmul.f32 %v4025_v45, %v448_v7  ;;  %v3295_v7 = vld [vmem:[%s4353_s10 + $0x28] sm:$0xff]  }
 0x161   : > { %v548_v60 = vpop.permute.xlu1 %547 }
 0x162   : > { %v619_v62 = vadd.f32 %v592_v19, %v579_v59  ;;  %v529_v15 = vadd.f32 %v521_v14, %v477_v10  ;;  %v573_v16 = vmul.f32 %v4027_v46, %v548_v60  ;;  %v3298_v10 = vld [vmem:[#allocation6 + $0xf0] sm:$0xff]  }
 0x163   : > { %v463_v25 = vpop.permute.xlu0 %462  ;;  %3047 = vmatprep.mubr.bf16.mxu1 %v3298_v10 }
 0x164   : > { %v627_v2 = vmax.f32 %v619_v62, 0.0  ;;  %v581_v20 = vadd.f32 %v573_v16, %v529_v15  ;;  %v480_v52 = vmul.f32 %v4025_v45, %v463_v25 }
 0x166   : > { %v588_v63 = vpop.permute.xlu1 %587 }
 0x167   : > { %v618_v0 = vadd.f32 %v588_v63, %v578_v61 }
 0x168   : > { %v500_v28 = vpop.permute.xlu0 %499 }
 0x169   : > { %v626_v1 = vmax.f32 %v618_v0, 0.0  ;;  %v522_v30 = vmul.f32 %v4023_v44, %v500_v28 }
 0x16b   : > { %v453_v3 = vpop.permute.xlu1 %452  ;;  %v650_v4 = vpack.c.bf16 %v627_v2, %v626_v1 }
 0x16c   : > { %v478_v31 = vmul.f32 %v4025_v45, %v453_v3  ;;  %v512_v33 = vpop.permute.xlu0 %511 }
 0x16d   : > { %2947 = vmatprep.subr.bf16.mxu0 %v650_v4  ;;  %v525_v39 = vmul.f32 %v4023_v44, %v512_v33 }
 0x16e   : > { %2948 = vmatpush3.bf16.msra.mxu0 %v650_v4  ;;  %v530_v37 = vadd.f32 %v522_v30, %v478_v31  ;;  %v3292_v4 = vld [vmem:[%s4353_s10 + $0x10] sm:$0xff]  }
 0x16f   : > { %v458_v5 = vpop.permute.xlu1 %457 }
 0x170   : > { %v479_v38 = vmul.f32 %v4025_v45, %v458_v5  ;;  %v3293_v5 = vld [vmem:[%s4353_s10 + $0x18] sm:$0xff]  }
 0x171   : > { %v604_v47 = vpop.permute.xlu0 %603 }
 0x174   : > { %v504_v6 = vpop.permute.xlu1 %503 }
 0x175   : > { %v523_v34 = vmul.f32 %v4023_v44, %v504_v6  ;;  %v616_v57 = vpop.permute.xlu0 %615  ;;  %v3294_v6 = vld [vmem:[%s4353_s10 + $0x20] sm:$0xff]  }
 0x177   : > { %v531_v41 = vadd.f32 %v523_v34, %v479_v38 }
 0x179   : > { %v552_v11 = vpop.permute.xlu1 %551  ;;  %v583_v56 = vadd.f32 %v575_v49, %v531_v41 }
 0x17a   : > { %v574_v35 = vmul.f32 %v4027_v46, %v552_v11  ;;  %v3302_v11 = vld [vmem:[#allocation6] sm:$0xff]   ;;  %v678_v14 = vpop.permute.xlu0 %677 }
 0x17c   : > { %v582_v42 = vadd.f32 %v574_v35, %v530_v37 }
 0x17e   : > { %v596_v17 = vpop.permute.xlu1 %595  ;;  %v622_v53 = vadd.f32 %v604_v47, %v582_v42  ;;  %v693_v16 = vpop.permute.xlu0 %692 }
 0x17f   : > { %v620_v19 = vadd.f32 %v596_v17, %v580_v18 }
 0x180   : > { %v630_v61 = vmax.f32 %v622_v53, 0.0 }
 0x181   : > { %v628_v23 = vmax.f32 %v620_v19, 0.0 }
 0x182   : > { %v600_v21 = vpop.permute.xlu1 %599  ;;  %v703_v18 = vpop.permute.xlu0 %702 }
 0x183   : > { %v621_v22 = vadd.f32 %v600_v21, %v581_v20 }
 0x185   : > { %v629_v24 = vmax.f32 %v621_v22, 0.0 }
 0x186   : > { %v713_v30 = vpop.permute.xlu0 %712 }
 0x187   : > { %v651_v26 = vpack.c.bf16 %v629_v24, %v628_v23  ;;  %v468_v27 = vpop.permute.xlu1 %467 }
 0x188   : > { %v481_v40 = vmul.f32 %v4025_v45, %v468_v27 }
 0x189   : > { %2949 = vmatprep.subr.bf16.mxu0 %v651_v26 }
 0x18a   : > { %2950 = vmatpush3.bf16.msra.mxu0 %v651_v26  ;;  %v533_v50 = vadd.f32 %v525_v39, %v481_v40  ;;  %v723_v47 = vpop.permute.xlu0 %722 }
 0x18c   : > { %v508_v29 = vpop.permute.xlu1 %507 }
 0x18d   : > { %v524_v51 = vmul.f32 %v4023_v44, %v508_v29 }
 0x18f   : > { %v532_v59 = vadd.f32 %v524_v51, %v480_v52 }
 0x191   : > { %v560_v36 = vpop.permute.xlu1 %559 }
 0x192   : > { %v576_v54 = vmul.f32 %v4027_v46, %v560_v36 }
 0x194   : > { %v584_v0 = vadd.f32 %v576_v54, %v532_v59  ;;  %v733_v59 = vpop.permute.xlu0 %732 }
 0x195   : > { %v564_v43 = vpop.permute.xlu1 %563 }
 0x196   : > { %v577_v48 = vmul.f32 %v4027_v46, %v564_v43  ;;  %v3291_v46 = vld [vmem:[%s4353_s10 + $0x8] sm:$0xff]  }
 0x198   : > { %v585_v55 = vadd.f32 %v577_v48, %v533_v50 }
 0x19a   : > { %v608_v58 = vpop.permute.xlu1 %607  ;;  %v625_v62 = vadd.f32 %v616_v57, %v585_v55 }
 0x19b   : > { %v623_v60 = vadd.f32 %v608_v58, %v583_v56 }
 0x19c   : > { %v633_v3 = vmax.f32 %v625_v62, 0.0 }
 0x19d   : > { %v631_v63 = vmax.f32 %v623_v60, 0.0 }
 0x19e   : > { %v612_v1 = vpop.permute.xlu1 %611 }
 0x19f   : > { %v652_v32 = vpack.c.bf16 %v631_v63, %v630_v61  ;;  %v624_v2 = vadd.f32 %v612_v1, %v584_v0 }
 0x1a1   : > { %v632_v44 = vmax.f32 %v624_v2, 0.0  ;;  %2951 = vmatprep.subr.bf16.mxu0 %v652_v32 }
 0x1a2   : > { %2952 = vmatpush3.bf16.msra.mxu0 %v652_v32 }
 0x1a3   : > { %v653_v45 = vpack.c.bf16 %v633_v3, %v632_v44  ;;  %v673_v12 = vpop.permute.xlu1 %672 }
 0x1a5   : > { %2953 = vmatprep.subr.bf16.mxu0 %v653_v45 }
 0x1a6   : > { %2954 = vmatpush3.bf16.msra.mxu0 %v653_v45 }
 0x1a7   : > { %v683_v13 = vpop.permute.xlu1 %682 }
 0x1a9   : > { %2956 = vmatmul.mubr.msk.bf16.vlgmr.msra.gmra.mrb[0].mxu0 %vm790_vm0, %v3291_v46  ;;  %v743_v46 = vpop.permute.xlu0 %742 }
 0x1aa   : > { %2959 = vmatprep.mubr.msk.bf16.mxu0 %vm790_vm0, %v3292_v4 }
 0x1ab   : > { %v688_v15 = vpop.permute.xlu1 %687 }
 0x1af   : > { %v698_v17 = vpop.permute.xlu1 %697 }
 0x1b1   : > { %2960 = vmatmul.mubr.msk.bf16.gmra.mrb[4].mxu0 %vm790_vm0, %v3293_v5 }
 0x1b2   : > { %2963 = vmatprep.mubr.msk.bf16.mxu0 %vm790_vm0, %v3294_v6 }
 0x1b3   : > { %v708_v22 = vpop.permute.xlu1 %707 }
 0x1b7   : > { %v718_v35 = vpop.permute.xlu1 %717 }
 0x1b9   : > { %2964 = vmatmul.mubr.msk.bf16.gmra.mrb[8].mxu0 %vm790_vm0, %v3295_v7 }
 0x1ba   : > { %2967 = vmatprep.mubr.msk.bf16.mxu0 %vm790_vm0, %v3296_v8 }
 0x1bb   : > { %v728_v51 = vpop.permute.xlu1 %727 }
 0x1bf   : > { %v738_v0 = vpop.permute.xlu1 %737 }
 0x1c1   : > { %2968 = vmatmul.mubr.msk.bf16.gmra.mrb[12].mxu0 %vm790_vm0, %v3297_v9 }
 0x1c2   : > { %2987 = vmatprep.mubr.bf16.mxu0 %v3302_v11 }
 0x1c3   : > { %v748_v8 = vpop.permute.xlu1 %747 }
 0x27c   : > { %v2957_v19 = vpop.f32.mrb[0].mxu0 }
 0x27d   : > { %v858_v20 = vadd.f32 %v2957_v19, %v683_v13  ;;  %v849_v21 = vpop.f32.mrb[1].mxu0 }
 0x27e   : > { %v850_v23 = vadd.f32 %v849_v21, %v673_v12  ;;  %v2958_v24 = vpop.f32.mrb[2].mxu0  ;;  %v3303_v21 = vld [vmem:[#allocation6 + $0x8] sm:$0xff]  }
 0x27f   : > { %v861_v25 = vadd.f32 %v2958_v24, %v688_v15  ;;  %v852_v26 = vpop.f32.mrb[3].mxu0  ;;  %v914_v28 = vmax.f32 %v858_v20, 0.0  ;;  %v3299_v20 = vld [vmem:[#allocation6 + $0xf8] sm:$0xff]   ;;  %v3301_v24 = vld [vmem:[#allocation6 + $0x108] sm:$0xff]  }
 0x280   : > { %v853_v27 = vadd.f32 %v852_v26, %v678_v14  ;;  %v912_v31 = vmax.f32 %v850_v23, 0.0  ;;  %v3306_v23 = vld [vmem:[#allocation6 + $0x10] sm:$0xff]  }
 0x281   : > { %v915_v29 = vmax.f32 %v861_v25, 0.0  ;;  %v3307_v25 = vld [vmem:[#allocation6 + $0x18] sm:$0xff]   ;;  %v3304_v26 = vld [vmem:[#allocation6 + $0x110] sm:$0xff]  }
 0x282   : > { %v913_v33 = vmax.f32 %v853_v27, 0.0  ;;  %v3310_v27 = vld [vmem:[#allocation6 + $0x20] sm:$0xff]  }
 0x283   : > { %v1057_v34 = vpack.c.bf16 %v915_v29, %v914_v28  ;;  %v3305_v28 = vld [vmem:[#allocation6 + $0x118] sm:$0xff]   ;;  %v3311_v29 = vld [vmem:[#allocation6 + $0x28] sm:$0xff]  }
 0x284   : > { %v1056_v36 = vpack.c.bf16 %v913_v33, %v912_v31  ;;  %v2961_v37 = vpop.f32.mrb[4].mxu0  ;;  %v3314_v31 = vld [vmem:[#allocation6 + $0x30] sm:$0xff]   ;;  %v3309_v33 = vld [vmem:[#allocation6 + $0x128] sm:$0xff]  }
 0x285   : > { %v874_v38 = vadd.f32 %v2961_v37, %v703_v18  ;;  %v865_v39 = vpop.f32.mrb[5].mxu0  ;;  %v3313_v37 = vld [vmem:[#allocation6 + $0x138] sm:$0xff]  }
 0x286   : > { %v866_v40 = vadd.f32 %v865_v39, %v693_v16  ;;  %v2962_v41 = vpop.f32.mrb[6].mxu0  ;;  %2971 = vmatprep.subr.bf16.mxu0 %v1056_v36  ;;  %3115 = vmatprep.subr.bf16.mxu1 %v1056_v36  ;;  %v3316_v39 = vld [vmem:[#allocation6 + $0x140] sm:$0xff]  }
 0x287   : > { %v877_v42 = vadd.f32 %v2962_v41, %v708_v22  ;;  %v868_v43 = vpop.f32.mrb[7].mxu0  ;;  %2972 = vmatpush3.bf16.msra.mxu0 %v1056_v36  ;;  %3123 = vmatpush3.bf16.msra.mxu1 %v1056_v36  ;;  %v918_v49 = vmax.f32 %v874_v38, 0.0  ;;  %v3300_v22 = vld [vmem:[#allocation6 + $0x100] sm:$0xff]   ;;  %v3319_v38 = vld [vmem:[#allocation6 + $0x48] sm:$0xff]  }
 0x288   : > { %v869_v48 = vadd.f32 %v868_v43, %v698_v17  ;;  %2973 = vmatprep.subr.bf16.mxu0 %v1057_v34  ;;  %3116 = vmatprep.subr.bf16.mxu1 %v1057_v34  ;;  %v916_v52 = vmax.f32 %v866_v40, 0.0  ;;  %v3318_v36 = vld [vmem:[#allocation6 + $0x40] sm:$0xff]   ;;  %v3322_v40 = vld [vmem:[#allocation6 + $0x50] sm:$0xff]   ;;  %v3317_v41 = vld [vmem:[#allocation6 + $0x148] sm:$0xff]  }
 0x289   : > { %v919_v50 = vmax.f32 %v877_v42, 0.0  ;;  %v3323_v42 = vld [vmem:[#allocation6 + $0x58] sm:$0xff]   ;;  %v3320_v43 = vld [vmem:[#allocation6 + $0x150] sm:$0xff]  }
 0x28a   : > { %v917_v53 = vmax.f32 %v869_v48, 0.0  ;;  %v3321_v48 = vld [vmem:[#allocation6 + $0x158] sm:$0xff]  }
 0x28b   : > { %v1059_v54 = vpack.c.bf16 %v919_v50, %v918_v49  ;;  %2974 = vmatpush3.bf16.msra.mxu0 %v1057_v34  ;;  %3124 = vmatpush3.bf16.msra.mxu1 %v1057_v34  ;;  %v3315_v34 = vld [vmem:[#allocation6 + $0x38] sm:$0xff]   ;;  %v3327_v49 = vld [vmem:[#allocation6 + $0x68] sm:$0xff]   ;;  %v3324_v50 = vld [vmem:[#allocation6 + $0x160] sm:$0xff]  }
 0x28c   : > { %v1058_v55 = vpack.c.bf16 %v917_v53, %v916_v52  ;;  %v2965_v56 = vpop.f32.mrb[8].mxu0  ;;  %v3325_v52 = vld [vmem:[#allocation6 + $0x168] sm:$0xff]   ;;  %v3331_v53 = vld [vmem:[#allocation6 + $0x78] sm:$0xff]  }
 0x28d   : > { %v890_v57 = vadd.f32 %v2965_v56, %v723_v47  ;;  %v881_v58 = vpop.f32.mrb[9].mxu0  ;;  %v3326_v47 = vld [vmem:[#allocation6 + $0x60] sm:$0xff]   ;;  %v3329_v56 = vld [vmem:[#allocation6 + $0x178] sm:$0xff]  }
 0x28e   : > { %v882_v60 = vadd.f32 %v881_v58, %v713_v30  ;;  %v2966_v61 = vpop.f32.mrb[10].mxu0  ;;  %2975 = vmatprep.subr.bf16.mxu0 %v1058_v55  ;;  %3117 = vmatprep.subr.bf16.mxu1 %v1058_v55  ;;  %v3308_v30 = vld [vmem:[#allocation6 + $0x120] sm:$0xff]  }
 0x28f   : > { %v893_v62 = vadd.f32 %v2966_v61, %v728_v51  ;;  %v884_v63 = vpop.f32.mrb[11].mxu0  ;;  %2976 = vmatpush3.bf16.msra.mxu0 %v1058_v55  ;;  %3125 = vmatpush3.bf16.msra.mxu1 %v1058_v55  ;;  %v922_v32 = vmax.f32 %v890_v57, 0.0  ;;  %v3330_v51 = vld [vmem:[#allocation6 + $0x70] sm:$0xff]   ;;  %v3334_v55 = vld [vmem:[#allocation6 + $0x80] sm:$0xff]   ;;  %v3335_v57 = vld [vmem:[#allocation6 + $0x88] sm:$0xff]  }
 0x290   : > { %v885_v1 = vadd.f32 %v884_v63, %v718_v35  ;;  %2977 = vmatprep.subr.bf16.mxu0 %v1059_v54  ;;  %3118 = vmatprep.subr.bf16.mxu1 %v1059_v54  ;;  %v920_v3 = vmax.f32 %v882_v60, 0.0  ;;  %v3312_v35 = vld [vmem:[#allocation6 + $0x130] sm:$0xff]   ;;  %v3332_v58 = vld [vmem:[#allocation6 + $0x180] sm:$0xff]   ;;  %v3333_v60 = vld [vmem:[#allocation6 + $0x188] sm:$0xff]  }
 0x291   : > { %v923_v2 = vmax.f32 %v893_v62, 0.0  ;;  %v3339_v61 = vld [vmem:[#allocation6 + $0x98] sm:$0xff]   ;;  %v3336_v62 = vld [vmem:[#allocation6 + $0x190] sm:$0xff]   ;;  %v3342_v63 = vld [vmem:[#allocation6 + $0xa0] sm:$0xff]  }
 0x292   : > { %v921_v44 = vmax.f32 %v885_v1, 0.0  ;;  %v3343_v1 = vld [vmem:[#allocation6 + $0xa8] sm:$0xff]  }
 0x293   : > { %v1061_v45 = vpack.c.bf16 %v923_v2, %v922_v32  ;;  %2978 = vmatpush3.bf16.msra.mxu0 %v1059_v54  ;;  %3126 = vmatpush3.bf16.msra.mxu1 %v1059_v54  ;;  %v3328_v54 = vld [vmem:[#allocation6 + $0x170] sm:$0xff]   ;;  %v3340_v32 = vld [vmem:[#allocation6 + $0x1a0] sm:$0xff]  }
 0x294   : > { %v1060_v4 = vpack.c.bf16 %v921_v44, %v920_v3  ;;  %v2969_v5 = vpop.f32.mrb[12].mxu0  ;;  %v3346_v2 = vld [vmem:[#allocation6 + $0xb0] sm:$0xff]   ;;  %v3341_v3 = vld [vmem:[#allocation6 + $0x1a8] sm:$0xff]   ;;  %v3347_v44 = vld [vmem:[#allocation6 + $0xb8] sm:$0xff]  }
 0x295   : > { %v906_v6 = vadd.f32 %v2969_v5, %v743_v46  ;;  %v897_v7 = vpop.f32.mrb[13].mxu0  ;;  %v3350_v46 = vld [vmem:[#allocation6 + $0xc0] sm:$0xff]   ;;  %v3351_v5 = vld [vmem:[#allocation6 + $0xc8] sm:$0xff]  }
 0x296   : > { %v898_v9 = vadd.f32 %v897_v7, %v733_v59  ;;  %v2970_v10 = vpop.f32.mrb[14].mxu0  ;;  %2979 = vmatprep.subr.bf16.mxu0 %v1060_v4  ;;  %3119 = vmatprep.subr.bf16.mxu1 %v1060_v4  ;;  %v3338_v59 = vld [vmem:[#allocation6 + $0x90] sm:$0xff]  }
 0x297   : > { %v909_v11 = vadd.f32 %v2970_v10, %v748_v8  ;;  %v900_v12 = vpop.f32.mrb[15].mxu0  ;;  %2980 = vmatpush3.bf16.msra.mxu0 %v1060_v4  ;;  %3127 = vmatpush3.bf16.msra.mxu1 %v1060_v4  ;;  %v926_v14 = vmax.f32 %v906_v6, 0.0  ;;  %v3345_v4 = vld [vmem:[#allocation6 + $0x1b8] sm:$0xff]   ;;  %v3348_v6 = vld [vmem:[#allocation6 + $0x1c0] sm:$0xff]   ;;  %v3354_v7 = vld [vmem:[#allocation6 + $0xd0] sm:$0xff]  }
 0x298   : > { %v901_v13 = vadd.f32 %v900_v12, %v738_v0  ;;  %2981 = vmatprep.subr.bf16.mxu0 %v1061_v45  ;;  %3120 = vmatprep.subr.bf16.mxu1 %v1061_v45  ;;  %v924_v16 = vmax.f32 %v898_v9, 0.0  ;;  %v3337_v0 = vld [vmem:[#allocation6 + $0x198] sm:$0xff]   ;;  %v3349_v8 = vld [vmem:[#allocation6 + $0x1c8] sm:$0xff]   ;;  %v3352_v10 = vld [vmem:[#allocation6 + $0x1d0] sm:$0xff]  }
 0x299   : > { %v927_v15 = vmax.f32 %v909_v11, 0.0  ;;  %v3355_v9 = vld [vmem:[#allocation6 + $0xd8] sm:$0xff]   ;;  %v3358_v11 = vld [vmem:[#allocation6 + $0xe0] sm:$0xff]  }
 0x29a   : > { %v925_v17 = vmax.f32 %v901_v13, 0.0  ;;  %v3353_v12 = vld [vmem:[#allocation6 + $0x1d8] sm:$0xff]   ;;  %v3359_v13 = vld [vmem:[#allocation6 + $0xe8] sm:$0xff]  }
 0x29b   : > { %v1063_v18 = vpack.c.bf16 %v927_v15, %v926_v14  ;;  %2982 = vmatpush3.bf16.msra.mxu0 %v1061_v45  ;;  %3128 = vmatpush3.bf16.msra.mxu1 %v1061_v45  ;;  %v3344_v45 = vld [vmem:[#allocation6 + $0x1b0] sm:$0xff]   ;;  %v3356_v14 = vld [vmem:[#allocation6 + $0x1e0] sm:$0xff]   ;;  %v3357_v15 = vld [vmem:[#allocation6 + $0x1e8] sm:$0xff]  }
 0x29c   : > { %v1062_v19 = vpack.c.bf16 %v925_v17, %v924_v16  ;;  %v3360_v16 = vld [vmem:[#allocation6 + $0x1f0] sm:$0xff]   ;;  %v3361_v17 = vld [vmem:[#allocation6 + $0x1f8] sm:$0xff]  }
 0x29e   : > { %2983 = vmatprep.subr.bf16.mxu0 %v1062_v19  ;;  %3121 = vmatprep.subr.bf16.mxu1 %v1062_v19 }
 0x29f   : > { %2984 = vmatpush3.bf16.msra.mxu0 %v1062_v19  ;;  %3129 = vmatpush3.bf16.msra.mxu1 %v1062_v19  ;;  %v1995_v19 = vld [vmem:[#allocation2 + $0x10] sm:$0xff] }
 0x2a0   : > { %2985 = vmatprep.subr.bf16.mxu0 %v1063_v18  ;;  %3122 = vmatprep.subr.bf16.mxu1 %v1063_v18 }
 0x2a3   : > { %2986 = vmatpush3.bf16.msra.mxu0 %v1063_v18  ;;  %3130 = vmatpush3.bf16.msra.mxu1 %v1063_v18  ;;  %v2055_v18 = vld [vmem:[#allocation2 + $0x1f0] sm:$0xff] }
 0x2a6   : > { %3048 = vmatmul.mubr.bf16.vlgmr.msra.gmra.mrb[0].mxu1 %v3299_v20  ;;  %2988 = vmatmul.mubr.bf16.vlgmr.msra.gmra.mrb[16].mxu0 %v3303_v21  ;;  %v2053_v20 = vld [vmem:[#allocation2 + $0x1e0] sm:$0xff] }
 0x2a7   : > { %3051 = vmatprep.mubr.bf16.mxu1 %v3300_v22  ;;  %2991 = vmatprep.mubr.bf16.mxu0 %v3306_v23  ;;  %v1993_v21 = vld [vmem:[#allocation2] sm:$0xff]  ;;  %v2056_v23 = vld [vmem:[#allocation2 + $0x1f8] sm:$0xff] }
 0x2ae   : > { %3052 = vmatmul.mubr.bf16.gmra.mrb[4].mxu1 %v3301_v24  ;;  %2992 = vmatmul.mubr.bf16.gmra.mrb[20].mxu0 %v3307_v25  ;;  %v1996_v25 = vld [vmem:[#allocation2 + $0x18] sm:$0xff] }
 0x2af   : > { %3055 = vmatprep.mubr.bf16.mxu1 %v3304_v26  ;;  %2995 = vmatprep.mubr.bf16.mxu0 %v3310_v27 }
 0x2b6   : > { %3056 = vmatmul.mubr.bf16.gmra.mrb[8].mxu1 %v3305_v28  ;;  %2996 = vmatmul.mubr.bf16.gmra.mrb[24].mxu0 %v3311_v29  ;;  %v2054_v28 = vld [vmem:[#allocation2 + $0x1e8] sm:$0xff] }
 0x2b7   : > { %3059 = vmatprep.mubr.bf16.mxu1 %v3308_v30  ;;  %2999 = vmatprep.mubr.bf16.mxu0 %v3314_v31  ;;  %v1994_v31 = vld [vmem:[#allocation2 + $0x8] sm:$0xff] }
 0x2be   : > { %3060 = vmatmul.mubr.bf16.gmra.mrb[12].mxu1 %v3309_v33  ;;  %3000 = vmatmul.mubr.bf16.gmra.mrb[28].mxu0 %v3315_v34 }
 0x2bf   : > { %3063 = vmatprep.mubr.bf16.mxu1 %v3312_v35  ;;  %3003 = vmatprep.mubr.bf16.mxu0 %v3318_v36 }
 0x2c6   : > { %3064 = vmatmul.mubr.bf16.gmra.mrb[16].mxu1 %v3313_v37  ;;  %3004 = vmatmul.mubr.bf16.gmra.mrb[32].mxu0 %v3319_v38 }
 0x2c7   : > { %3067 = vmatprep.mubr.bf16.mxu1 %v3316_v39  ;;  %3007 = vmatprep.mubr.bf16.mxu0 %v3322_v40 }
 0x2ce   : > { %3068 = vmatmul.mubr.bf16.gmra.mrb[20].mxu1 %v3317_v41  ;;  %3008 = vmatmul.mubr.bf16.gmra.mrb[36].mxu0 %v3323_v42 }
 0x2cf   : > { %3071 = vmatprep.mubr.bf16.mxu1 %v3320_v43  ;;  %3011 = vmatprep.mubr.bf16.mxu0 %v3326_v47  ;;  %v2059_v43 = vld [vmem:[#allocation2 + $0x210] sm:$0xff] }
 0x2d0   : > { %v1999_v47 = vld [vmem:[#allocation2 + $0x30] sm:$0xff] }
 0x2d6   : > { %3072 = vmatmul.mubr.bf16.gmra.mrb[24].mxu1 %v3321_v48  ;;  %3012 = vmatmul.mubr.bf16.gmra.mrb[40].mxu0 %v3327_v49  ;;  %v2057_v48 = vld [vmem:[#allocation2 + $0x200] sm:$0xff] }
 0x2d7   : > { %3075 = vmatprep.mubr.bf16.mxu1 %v3324_v50  ;;  %3015 = vmatprep.mubr.bf16.mxu0 %v3330_v51  ;;  %v1997_v49 = vld [vmem:[#allocation2 + $0x20] sm:$0xff]  ;;  %v2060_v51 = vld [vmem:[#allocation2 + $0x218] sm:$0xff] }
 0x2de   : > { %3076 = vmatmul.mubr.bf16.gmra.mrb[28].mxu1 %v3325_v52  ;;  %3016 = vmatmul.mubr.bf16.gmra.mrb[44].mxu0 %v3331_v53  ;;  %v2000_v53 = vld [vmem:[#allocation2 + $0x38] sm:$0xff] }
 0x2df   : > { %3079 = vmatprep.mubr.bf16.mxu1 %v3328_v54  ;;  %3019 = vmatprep.mubr.bf16.mxu0 %v3334_v55 }
 0x2e6   : > { %3080 = vmatmul.mubr.bf16.gmra.mrb[32].mxu1 %v3329_v56  ;;  %3020 = vmatmul.mubr.bf16.gmra.mrb[48].mxu0 %v3335_v57  ;;  %v2058_v56 = vld [vmem:[#allocation2 + $0x208] sm:$0xff] }
 0x2e7   : > { %3083 = vmatprep.mubr.bf16.mxu1 %v3332_v58  ;;  %3023 = vmatprep.mubr.bf16.mxu0 %v3338_v59  ;;  %v1998_v59 = vld [vmem:[#allocation2 + $0x28] sm:$0xff] }
 0x2ee   : > { %3084 = vmatmul.mubr.bf16.gmra.mrb[36].mxu1 %v3333_v60  ;;  %3024 = vmatmul.mubr.bf16.gmra.mrb[52].mxu0 %v3339_v61 }
 0x2ef   : > { %3087 = vmatprep.mubr.bf16.mxu1 %v3336_v62  ;;  %3027 = vmatprep.mubr.bf16.mxu0 %v3342_v63 }
 0x2f6   : > { %3088 = vmatmul.mubr.bf16.gmra.mrb[40].mxu1 %v3337_v0  ;;  %3028 = vmatmul.mubr.bf16.gmra.mrb[56].mxu0 %v3343_v1 }
 0x2f7   : > { %3091 = vmatprep.mubr.bf16.mxu1 %v3340_v32  ;;  %3031 = vmatprep.mubr.bf16.mxu0 %v3346_v2 }
 0x2fe   : > { %3092 = vmatmul.mubr.bf16.gmra.mrb[44].mxu1 %v3341_v3  ;;  %3032 = vmatmul.mubr.bf16.gmra.mrb[60].mxu0 %v3347_v44 }
 0x2ff   : > { %3095 = vmatprep.mubr.bf16.mxu1 %v3344_v45  ;;  %3035 = vmatprep.mubr.bf16.mxu0 %v3350_v46  ;;  %v2063_v45 = vld [vmem:[#allocation2 + $0x230] sm:$0xff] }
 0x300   : > { %v2003_v46 = vld [vmem:[#allocation2 + $0x50] sm:$0xff] }
 0x306   : > { %3096 = vmatmul.mubr.bf16.gmra.mrb[48].mxu1 %v3345_v4  ;;  %3036 = vmatmul.mubr.bf16.gmra.mrb[64].mxu0 %v3351_v5  ;;  %v2061_v4 = vld [vmem:[#allocation2 + $0x220] sm:$0xff] }
 0x307   : > { %3099 = vmatprep.mubr.bf16.mxu1 %v3348_v6  ;;  %3039 = vmatprep.mubr.bf16.mxu0 %v3354_v7  ;;  %v2001_v5 = vld [vmem:[#allocation2 + $0x40] sm:$0xff]  ;;  %v2064_v7 = vld [vmem:[#allocation2 + $0x238] sm:$0xff] }
 0x30e   : > { %3100 = vmatmul.mubr.bf16.gmra.mrb[52].mxu1 %v3349_v8  ;;  %3040 = vmatmul.mubr.bf16.gmra.mrb[68].mxu0 %v3355_v9  ;;  %v2004_v9 = vld [vmem:[#allocation2 + $0x58] sm:$0xff] }
 0x30f   : > { %3103 = vmatprep.mubr.bf16.mxu1 %v3352_v10  ;;  %3043 = vmatprep.mubr.bf16.mxu0 %v3358_v11 }
 0x316   : > { %3104 = vmatmul.mubr.bf16.gmra.mrb[56].mxu1 %v3353_v12  ;;  %3044 = vmatmul.mubr.bf16.gmra.mrb[72].mxu0 %v3359_v13  ;;  %v2062_v12 = vld [vmem:[#allocation2 + $0x228] sm:$0xff] }
 0x317   : > { %3107 = vmatprep.mubr.bf16.mxu1 %v3356_v14 }
 0x31e   : > { %3108 = vmatmul.mubr.bf16.gmra.mrb[60].mxu1 %v3357_v15  ;;  %v2002_v15 = vld [vmem:[#allocation2 + $0x48] sm:$0xff] }
 0x31f   : > { %3111 = vmatprep.mubr.bf16.mxu1 %v3360_v16 }
 0x326   : > { %3112 = vmatmul.mubr.bf16.gmra.mrb[64].mxu1 %v3361_v17 }
 0x379   : > { %v3049_v22 = vpop.f32.mrb[0].mxu1  ;;  %v2989_v24 = vpop.f32.mrb[16].mxu0 }
 0x37a   : > { %v2183_v26 = vmax.f32 %v2055_v18, %v3049_v22  ;;  %v1722_v27 = vpop.f32.mrb[1].mxu1  ;;  %v2123_v29 = vmax.f32 %v1995_v19, %v2989_v24  ;;  %v1482_v30 = vpop.f32.mrb[17].mxu0 }
 0x37b   : > { %v2181_v33 = vmax.f32 %v2053_v20, %v1722_v27  ;;  %v3050_v34 = vpop.f32.mrb[2].mxu1  ;;  %v2121_v35 = vmax.f32 %v1993_v21, %v1482_v30  ;;  %v2990_v36 = vpop.f32.mrb[18].mxu0  ;;  %v2007_v27 = vld [vmem:[#allocation2 + $0x70] sm:$0xff] }
 0x37c   : > { %2311 = vst [vmem:[#allocation2 + $0x1f0] sm:$0xff] %v2183_v26  ;;  %v2184_v37 = vmax.f32 %v2056_v23, %v3050_v34  ;;  %v1725_v38 = vpop.f32.mrb[3].mxu1  ;;  %2251 = vst [vmem:[#allocation2 + $0x10] sm:$0xff] %v2123_v29  ;;  %v2124_v39 = vmax.f32 %v1996_v25, %v2990_v36  ;;  %v1485_v40 = vpop.f32.mrb[19].mxu0  ;;  %v2067_v26 = vld [vmem:[#allocation2 + $0x250] sm:$0xff]  ;;  %v2005_v29 = vld [vmem:[#allocation2 + $0x60] sm:$0xff] }
 0x37d   : > { %2309 = vst [vmem:[#allocation2 + $0x1e0] sm:$0xff] %v2181_v33  ;;  %v2182_v41 = vmax.f32 %v2054_v28, %v1725_v38  ;;  %2249 = vst [vmem:[#allocation2] sm:$0xff] %v2121_v35  ;;  %v2122_v42 = vmax.f32 %v1994_v31, %v1485_v40  ;;  %v2065_v28 = vld [vmem:[#allocation2 + $0x240] sm:$0xff]  ;;  %v2068_v31 = vld [vmem:[#allocation2 + $0x258] sm:$0xff] }
 0x37e   : > { %2312 = vst [vmem:[#allocation2 + $0x1f8] sm:$0xff] %v2184_v37  ;;  %2252 = vst [vmem:[#allocation2 + $0x18] sm:$0xff] %v2124_v39  ;;  %v2008_v34 = vld [vmem:[#allocation2 + $0x78] sm:$0xff]  ;;  %v2066_v37 = vld [vmem:[#allocation2 + $0x248] sm:$0xff] }
 0x37f   : > { %2310 = vst [vmem:[#allocation2 + $0x1e8] sm:$0xff] %v2182_v41  ;;  %2250 = vst [vmem:[#allocation2 + $0x8] sm:$0xff] %v2122_v42  ;;  %v2006_v40 = vld [vmem:[#allocation2 + $0x68] sm:$0xff] }
 0x381   : > { %v3053_v50 = vpop.f32.mrb[4].mxu1  ;;  %v2993_v52 = vpop.f32.mrb[20].mxu0 }
 0x382   : > { %v2187_v54 = vmax.f32 %v2059_v43, %v3053_v50  ;;  %v1738_v55 = vpop.f32.mrb[5].mxu1  ;;  %v2127_v57 = vmax.f32 %v1999_v47, %v2993_v52  ;;  %v1498_v58 = vpop.f32.mrb[21].mxu0 }
 0x383   : > { %v2185_v60 = vmax.f32 %v2057_v48, %v1738_v55  ;;  %v3054_v61 = vpop.f32.mrb[6].mxu1  ;;  %v2125_v62 = vmax.f32 %v1997_v49, %v1498_v58  ;;  %v2994_v63 = vpop.f32.mrb[22].mxu0  ;;  %v2011_v55 = vld [vmem:[#allocation2 + $0x90] sm:$0xff] }
 0x384   : > { %2315 = vst [vmem:[#allocation2 + $0x210] sm:$0xff] %v2187_v54  ;;  %v2188_v0 = vmax.f32 %v2060_v51, %v3054_v61  ;;  %v1741_v1 = vpop.f32.mrb[7].mxu1  ;;  %2255 = vst [vmem:[#allocation2 + $0x30] sm:$0xff] %v2127_v57  ;;  %v2128_v32 = vmax.f32 %v2000_v53, %v2994_v63  ;;  %v1501_v2 = vpop.f32.mrb[23].mxu0  ;;  %v2071_v54 = vld [vmem:[#allocation2 + $0x270] sm:$0xff]  ;;  %v2009_v57 = vld [vmem:[#allocation2 + $0x80] sm:$0xff] }
 0x385   : > { %2313 = vst [vmem:[#allocation2 + $0x200] sm:$0xff] %v2185_v60  ;;  %v2186_v3 = vmax.f32 %v2058_v56, %v1741_v1  ;;  %2253 = vst [vmem:[#allocation2 + $0x20] sm:$0xff] %v2125_v62  ;;  %v2126_v44 = vmax.f32 %v1998_v59, %v1501_v2  ;;  %v2069_v56 = vld [vmem:[#allocation2 + $0x260] sm:$0xff]  ;;  %v2072_v59 = vld [vmem:[#allocation2 + $0x278] sm:$0xff] }
 0x386   : > { %2316 = vst [vmem:[#allocation2 + $0x218] sm:$0xff] %v2188_v0  ;;  %2256 = vst [vmem:[#allocation2 + $0x38] sm:$0xff] %v2128_v32  ;;  %v2012_v61 = vld [vmem:[#allocation2 + $0x98] sm:$0xff]  ;;  %v2070_v0 = vld [vmem:[#allocation2 + $0x268] sm:$0xff] }
 0x387   : > { %2314 = vst [vmem:[#allocation2 + $0x208] sm:$0xff] %v2186_v3  ;;  %2254 = vst [vmem:[#allocation2 + $0x28] sm:$0xff] %v2126_v44  ;;  %v2010_v2 = vld [vmem:[#allocation2 + $0x88] sm:$0xff] }
 0x389   : > { %v3057_v6 = vpop.f32.mrb[8].mxu1  ;;  %v2997_v8 = vpop.f32.mrb[24].mxu0 }
 0x38a   : > { %v2191_v10 = vmax.f32 %v2063_v45, %v3057_v6  ;;  %v1754_v11 = vpop.f32.mrb[9].mxu1  ;;  %v2131_v13 = vmax.f32 %v2003_v46, %v2997_v8  ;;  %v1514_v14 = vpop.f32.mrb[25].mxu0 }
 0x38b   : > { %v2189_v16 = vmax.f32 %v2061_v4, %v1754_v11  ;;  %v3058_v17 = vpop.f32.mrb[10].mxu1  ;;  %v2129_v18 = vmax.f32 %v2001_v5, %v1514_v14  ;;  %v2998_v19 = vpop.f32.mrb[26].mxu0  ;;  %v2015_v11 = vld [vmem:[#allocation2 + $0xb0] sm:$0xff] }
 0x38c   : > { %2319 = vst [vmem:[#allocation2 + $0x230] sm:$0xff] %v2191_v10  ;;  %v2192_v20 = vmax.f32 %v2064_v7, %v3058_v17  ;;  %v1757_v21 = vpop.f32.mrb[11].mxu1  ;;  %2259 = vst [vmem:[#allocation2 + $0x50] sm:$0xff] %v2131_v13  ;;  %v2132_v22 = vmax.f32 %v2004_v9, %v2998_v19  ;;  %v1517_v23 = vpop.f32.mrb[27].mxu0  ;;  %v2075_v10 = vld [vmem:[#allocation2 + $0x290] sm:$0xff]  ;;  %v2013_v13 = vld [vmem:[#allocation2 + $0xa0] sm:$0xff] }
 0x38d   : > { %2317 = vst [vmem:[#allocation2 + $0x220] sm:$0xff] %v2189_v16  ;;  %v2190_v24 = vmax.f32 %v2062_v12, %v1757_v21  ;;  %2257 = vst [vmem:[#allocation2 + $0x40] sm:$0xff] %v2129_v18  ;;  %v2130_v25 = vmax.f32 %v2002_v15, %v1517_v23  ;;  %v2073_v12 = vld [vmem:[#allocation2 + $0x280] sm:$0xff]  ;;  %v2076_v15 = vld [vmem:[#allocation2 + $0x298] sm:$0xff] }
 0x38e   : > { %2320 = vst [vmem:[#allocation2 + $0x238] sm:$0xff] %v2192_v20  ;;  %2260 = vst [vmem:[#allocation2 + $0x58] sm:$0xff] %v2132_v22  ;;  %v2016_v17 = vld [vmem:[#allocation2 + $0xb8] sm:$0xff]  ;;  %v2074_v20 = vld [vmem:[#allocation2 + $0x288] sm:$0xff] }
 0x38f   : > { %2318 = vst [vmem:[#allocation2 + $0x228] sm:$0xff] %v2190_v24  ;;  %2258 = vst [vmem:[#allocation2 + $0x48] sm:$0xff] %v2130_v25  ;;  %v2014_v23 = vld [vmem:[#allocation2 + $0xa8] sm:$0xff] }
 0x391   : > { %v3061_v30 = vpop.f32.mrb[12].mxu1  ;;  %v3001_v33 = vpop.f32.mrb[28].mxu0 }
 0x392   : > { %v2195_v35 = vmax.f32 %v2067_v26, %v3061_v30  ;;  %v1770_v36 = vpop.f32.mrb[13].mxu1  ;;  %v2135_v38 = vmax.f32 %v2007_v27, %v3001_v33  ;;  %v1530_v39 = vpop.f32.mrb[29].mxu0 }
 0x393   : > { %v2193_v41 = vmax.f32 %v2065_v28, %v1770_v36  ;;  %v3062_v42 = vpop.f32.mrb[14].mxu1  ;;  %v2133_v43 = vmax.f32 %v2005_v29, %v1530_v39  ;;  %v3002_v47 = vpop.f32.mrb[30].mxu0  ;;  %v2019_v36 = vld [vmem:[#allocation2 + $0xd0] sm:$0xff] }
 0x394   : > { %2323 = vst [vmem:[#allocation2 + $0x250] sm:$0xff] %v2195_v35  ;;  %v2196_v48 = vmax.f32 %v2068_v31, %v3062_v42  ;;  %v1773_v49 = vpop.f32.mrb[15].mxu1  ;;  %2263 = vst [vmem:[#allocation2 + $0x70] sm:$0xff] %v2135_v38  ;;  %v2136_v50 = vmax.f32 %v2008_v34, %v3002_v47  ;;  %v1533_v51 = vpop.f32.mrb[31].mxu0  ;;  %v2079_v35 = vld [vmem:[#allocation2 + $0x2b0] sm:$0xff]  ;;  %v2017_v38 = vld [vmem:[#allocation2 + $0xc0] sm:$0xff] }
 0x395   : > { %2321 = vst [vmem:[#allocation2 + $0x240] sm:$0xff] %v2193_v41  ;;  %v2194_v52 = vmax.f32 %v2066_v37, %v1773_v49  ;;  %2261 = vst [vmem:[#allocation2 + $0x60] sm:$0xff] %v2133_v43  ;;  %v2134_v53 = vmax.f32 %v2006_v40, %v1533_v51  ;;  %v2077_v37 = vld [vmem:[#allocation2 + $0x2a0] sm:$0xff]  ;;  %v2080_v40 = vld [vmem:[#allocation2 + $0x2b8] sm:$0xff] }
 0x396   : > { %2324 = vst [vmem:[#allocation2 + $0x258] sm:$0xff] %v2196_v48  ;;  %2264 = vst [vmem:[#allocation2 + $0x78] sm:$0xff] %v2136_v50  ;;  %v2020_v42 = vld [vmem:[#allocation2 + $0xd8] sm:$0xff]  ;;  %v2078_v48 = vld [vmem:[#allocation2 + $0x2a8] sm:$0xff] }
 0x397   : > { %2322 = vst [vmem:[#allocation2 + $0x248] sm:$0xff] %v2194_v52  ;;  %2262 = vst [vmem:[#allocation2 + $0x68] sm:$0xff] %v2134_v53  ;;  %v2018_v51 = vld [vmem:[#allocation2 + $0xc8] sm:$0xff] }
 0x399   : > { %v3065_v58 = vpop.f32.mrb[16].mxu1  ;;  %v3005_v60 = vpop.f32.mrb[32].mxu0 }
 0x39a   : > { %v2199_v62 = vmax.f32 %v2071_v54, %v3065_v58  ;;  %v1786_v63 = vpop.f32.mrb[17].mxu1  ;;  %v2139_v1 = vmax.f32 %v2011_v55, %v3005_v60  ;;  %v1546_v32 = vpop.f32.mrb[33].mxu0 }
 0x39b   : > { %v2197_v3 = vmax.f32 %v2069_v56, %v1786_v63  ;;  %v3066_v44 = vpop.f32.mrb[18].mxu1  ;;  %v2137_v45 = vmax.f32 %v2009_v57, %v1546_v32  ;;  %v3006_v46 = vpop.f32.mrb[34].mxu0  ;;  %v2023_v63 = vld [vmem:[#allocation2 + $0xf0] sm:$0xff] }
 0x39c   : > { %2327 = vst [vmem:[#allocation2 + $0x270] sm:$0xff] %v2199_v62  ;;  %v2200_v4 = vmax.f32 %v2072_v59, %v3066_v44  ;;  %v1789_v5 = vpop.f32.mrb[19].mxu1  ;;  %2267 = vst [vmem:[#allocation2 + $0x90] sm:$0xff] %v2139_v1  ;;  %v2140_v6 = vmax.f32 %v2012_v61, %v3006_v46  ;;  %v1549_v7 = vpop.f32.mrb[35].mxu0  ;;  %v2083_v62 = vld [vmem:[#allocation2 + $0x2d0] sm:$0xff]  ;;  %v2021_v1 = vld [vmem:[#allocation2 + $0xe0] sm:$0xff] }
 0x39d   : > { %2325 = vst [vmem:[#allocation2 + $0x260] sm:$0xff] %v2197_v3  ;;  %v2198_v8 = vmax.f32 %v2070_v0, %v1789_v5  ;;  %2265 = vst [vmem:[#allocation2 + $0x80] sm:$0xff] %v2137_v45  ;;  %v2138_v9 = vmax.f32 %v2010_v2, %v1549_v7  ;;  %v2081_v0 = vld [vmem:[#allocation2 + $0x2c0] sm:$0xff]  ;;  %v2084_v2 = vld [vmem:[#allocation2 + $0x2d8] sm:$0xff] }
 0x39e   : > { %2328 = vst [vmem:[#allocation2 + $0x278] sm:$0xff] %v2200_v4  ;;  %2268 = vst [vmem:[#allocation2 + $0x98] sm:$0xff] %v2140_v6  ;;  %v2024_v44 = vld [vmem:[#allocation2 + $0xf8] sm:$0xff]  ;;  %v2082_v4 = vld [vmem:[#allocation2 + $0x2c8] sm:$0xff] }
 0x39f   : > { %2326 = vst [vmem:[#allocation2 + $0x268] sm:$0xff] %v2198_v8  ;;  %2266 = vst [vmem:[#allocation2 + $0x88] sm:$0xff] %v2138_v9  ;;  %v2022_v7 = vld [vmem:[#allocation2 + $0xe8] sm:$0xff] }
 0x3a1   : > { %v3069_v14 = vpop.f32.mrb[20].mxu1  ;;  %v3009_v16 = vpop.f32.mrb[36].mxu0 }
 0x3a2   : > { %v2203_v18 = vmax.f32 %v2075_v10, %v3069_v14  ;;  %v1802_v19 = vpop.f32.mrb[21].mxu1  ;;  %v2143_v21 = vmax.f32 %v2015_v11, %v3009_v16  ;;  %v1562_v22 = vpop.f32.mrb[37].mxu0 }
 0x3a3   : > { %v2201_v24 = vmax.f32 %v2073_v12, %v1802_v19  ;;  %v3070_v25 = vpop.f32.mrb[22].mxu1  ;;  %v2141_v26 = vmax.f32 %v2013_v13, %v1562_v22  ;;  %v3010_v27 = vpop.f32.mrb[38].mxu0  ;;  %v2027_v19 = vld [vmem:[#allocation2 + $0x110] sm:$0xff] }
 0x3a4   : > { %2331 = vst [vmem:[#allocation2 + $0x290] sm:$0xff] %v2203_v18  ;;  %v2204_v28 = vmax.f32 %v2076_v15, %v3070_v25  ;;  %v1805_v29 = vpop.f32.mrb[23].mxu1  ;;  %2271 = vst [vmem:[#allocation2 + $0xb0] sm:$0xff] %v2143_v21  ;;  %v2144_v30 = vmax.f32 %v2016_v17, %v3010_v27  ;;  %v1565_v31 = vpop.f32.mrb[39].mxu0  ;;  %v2087_v18 = vld [vmem:[#allocation2 + $0x2f0] sm:$0xff]  ;;  %v2025_v21 = vld [vmem:[#allocation2 + $0x100] sm:$0xff] }
 0x3a5   : > { %2329 = vst [vmem:[#allocation2 + $0x280] sm:$0xff] %v2201_v24  ;;  %v2202_v33 = vmax.f32 %v2074_v20, %v1805_v29  ;;  %2269 = vst [vmem:[#allocation2 + $0xa0] sm:$0xff] %v2141_v26  ;;  %v2142_v34 = vmax.f32 %v2014_v23, %v1565_v31  ;;  %v2085_v20 = vld [vmem:[#allocation2 + $0x2e0] sm:$0xff]  ;;  %v2088_v23 = vld [vmem:[#allocation2 + $0x2f8] sm:$0xff] }
 0x3a6   : > { %2332 = vst [vmem:[#allocation2 + $0x298] sm:$0xff] %v2204_v28  ;;  %2272 = vst [vmem:[#allocation2 + $0xb8] sm:$0xff] %v2144_v30  ;;  %v2028_v25 = vld [vmem:[#allocation2 + $0x118] sm:$0xff]  ;;  %v2086_v28 = vld [vmem:[#allocation2 + $0x2e8] sm:$0xff] }
 0x3a7   : > { %2330 = vst [vmem:[#allocation2 + $0x288] sm:$0xff] %v2202_v33  ;;  %2270 = vst [vmem:[#allocation2 + $0xa8] sm:$0xff] %v2142_v34  ;;  %v2026_v31 = vld [vmem:[#allocation2 + $0x108] sm:$0xff] }
 0x3a9   : > { %v3073_v39 = vpop.f32.mrb[24].mxu1  ;;  %v3013_v41 = vpop.f32.mrb[40].mxu0 }
 0x3aa   : > { %v2207_v43 = vmax.f32 %v2079_v35, %v3073_v39  ;;  %v1818_v47 = vpop.f32.mrb[25].mxu1  ;;  %v2147_v49 = vmax.f32 %v2019_v36, %v3013_v41  ;;  %v1578_v50 = vpop.f32.mrb[41].mxu0 }
 0x3ab   : > { %v2205_v52 = vmax.f32 %v2077_v37, %v1818_v47  ;;  %v3074_v53 = vpop.f32.mrb[26].mxu1  ;;  %v2145_v54 = vmax.f32 %v2017_v38, %v1578_v50  ;;  %v3014_v55 = vpop.f32.mrb[42].mxu0  ;;  %v2031_v47 = vld [vmem:[#allocation2 + $0x130] sm:$0xff] }
 0x3ac   : > { %2335 = vst [vmem:[#allocation2 + $0x2b0] sm:$0xff] %v2207_v43  ;;  %v2208_v56 = vmax.f32 %v2080_v40, %v3074_v53  ;;  %v1821_v57 = vpop.f32.mrb[27].mxu1  ;;  %2275 = vst [vmem:[#allocation2 + $0xd0] sm:$0xff] %v2147_v49  ;;  %v2148_v58 = vmax.f32 %v2020_v42, %v3014_v55  ;;  %v1581_v59 = vpop.f32.mrb[43].mxu0  ;;  %v2091_v43 = vld [vmem:[#allocation2 + $0x310] sm:$0xff]  ;;  %v2029_v49 = vld [vmem:[#allocation2 + $0x120] sm:$0xff] }
 0x3ad   : > { %2333 = vst [vmem:[#allocation2 + $0x2a0] sm:$0xff] %v2205_v52  ;;  %v2206_v60 = vmax.f32 %v2078_v48, %v1821_v57  ;;  %2273 = vst [vmem:[#allocation2 + $0xc0] sm:$0xff] %v2145_v54  ;;  %v2146_v61 = vmax.f32 %v2018_v51, %v1581_v59  ;;  %v2089_v48 = vld [vmem:[#allocation2 + $0x300] sm:$0xff]  ;;  %v2092_v51 = vld [vmem:[#allocation2 + $0x318] sm:$0xff] }
 0x3ae   : > { %2336 = vst [vmem:[#allocation2 + $0x2b8] sm:$0xff] %v2208_v56  ;;  %2276 = vst [vmem:[#allocation2 + $0xd8] sm:$0xff] %v2148_v58  ;;  %v2032_v53 = vld [vmem:[#allocation2 + $0x138] sm:$0xff]  ;;  %v2090_v56 = vld [vmem:[#allocation2 + $0x308] sm:$0xff] }
 0x3af   : > { %2334 = vst [vmem:[#allocation2 + $0x2a8] sm:$0xff] %v2206_v60  ;;  %2274 = vst [vmem:[#allocation2 + $0xc8] sm:$0xff] %v2146_v61  ;;  %v2030_v59 = vld [vmem:[#allocation2 + $0x128] sm:$0xff] }
 0x3b1   : > { %v3077_v32 = vpop.f32.mrb[28].mxu1  ;;  %v3017_v3 = vpop.f32.mrb[44].mxu0 }
 0x3b2   : > { %v2211_v45 = vmax.f32 %v2083_v62, %v3077_v32  ;;  %v1834_v46 = vpop.f32.mrb[29].mxu1  ;;  %v2151_v5 = vmax.f32 %v2023_v63, %v3017_v3  ;;  %v1594_v6 = vpop.f32.mrb[45].mxu0 }
 0x3b3   : > { %v2209_v8 = vmax.f32 %v2081_v0, %v1834_v46  ;;  %v3078_v9 = vpop.f32.mrb[30].mxu1  ;;  %v2149_v10 = vmax.f32 %v2021_v1, %v1594_v6  ;;  %v3018_v11 = vpop.f32.mrb[46].mxu0  ;;  %v2035_v46 = vld [vmem:[#allocation2 + $0x150] sm:$0xff] }
 0x3b4   : > { %2339 = vst [vmem:[#allocation2 + $0x2d0] sm:$0xff] %v2211_v45  ;;  %v2212_v12 = vmax.f32 %v2084_v2, %v3078_v9  ;;  %v1837_v13 = vpop.f32.mrb[31].mxu1  ;;  %2279 = vst [vmem:[#allocation2 + $0xf0] sm:$0xff] %v2151_v5  ;;  %v2152_v14 = vmax.f32 %v2024_v44, %v3018_v11  ;;  %v1597_v15 = vpop.f32.mrb[47].mxu0  ;;  %v2095_v45 = vld [vmem:[#allocation2 + $0x330] sm:$0xff]  ;;  %v2033_v5 = vld [vmem:[#allocation2 + $0x140] sm:$0xff] }
 0x3b5   : > { %2337 = vst [vmem:[#allocation2 + $0x2c0] sm:$0xff] %v2209_v8  ;;  %v2210_v16 = vmax.f32 %v2082_v4, %v1837_v13  ;;  %2277 = vst [vmem:[#allocation2 + $0xe0] sm:$0xff] %v2149_v10  ;;  %v2150_v17 = vmax.f32 %v2022_v7, %v1597_v15  ;;  %v2093_v4 = vld [vmem:[#allocation2 + $0x320] sm:$0xff]  ;;  %v2096_v7 = vld [vmem:[#allocation2 + $0x338] sm:$0xff] }
 0x3b6   : > { %2340 = vst [vmem:[#allocation2 + $0x2d8] sm:$0xff] %v2212_v12  ;;  %2280 = vst [vmem:[#allocation2 + $0xf8] sm:$0xff] %v2152_v14  ;;  %v2036_v9 = vld [vmem:[#allocation2 + $0x158] sm:$0xff]  ;;  %v2094_v12 = vld [vmem:[#allocation2 + $0x328] sm:$0xff] }
 0x3b7   : > { %2338 = vst [vmem:[#allocation2 + $0x2c8] sm:$0xff] %v2210_v16  ;;  %2278 = vst [vmem:[#allocation2 + $0xe8] sm:$0xff] %v2150_v17  ;;  %v2034_v15 = vld [vmem:[#allocation2 + $0x148] sm:$0xff] }
 0x3b9   : > { %v3081_v22 = vpop.f32.mrb[32].mxu1  ;;  %v3021_v24 = vpop.f32.mrb[48].mxu0 }
 0x3ba   : > { %v2215_v26 = vmax.f32 %v2087_v18, %v3081_v22  ;;  %v1850_v27 = vpop.f32.mrb[33].mxu1  ;;  %v2155_v29 = vmax.f32 %v2027_v19, %v3021_v24  ;;  %v1610_v30 = vpop.f32.mrb[49].mxu0 }
 0x3bb   : > { %v2213_v33 = vmax.f32 %v2085_v20, %v1850_v27  ;;  %v3082_v34 = vpop.f32.mrb[34].mxu1  ;;  %v2153_v35 = vmax.f32 %v2025_v21, %v1610_v30  ;;  %v3022_v36 = vpop.f32.mrb[50].mxu0  ;;  %v2039_v27 = vld [vmem:[#allocation2 + $0x170] sm:$0xff] }
 0x3bc   : > { %2343 = vst [vmem:[#allocation2 + $0x2f0] sm:$0xff] %v2215_v26  ;;  %v2216_v37 = vmax.f32 %v2088_v23, %v3082_v34  ;;  %v1853_v38 = vpop.f32.mrb[35].mxu1  ;;  %2283 = vst [vmem:[#allocation2 + $0x110] sm:$0xff] %v2155_v29  ;;  %v2156_v39 = vmax.f32 %v2028_v25, %v3022_v36  ;;  %v1613_v40 = vpop.f32.mrb[51].mxu0  ;;  %v2099_v26 = vld [vmem:[#allocation2 + $0x350] sm:$0xff]  ;;  %v2037_v29 = vld [vmem:[#allocation2 + $0x160] sm:$0xff] }
 0x3bd   : > { %2341 = vst [vmem:[#allocation2 + $0x2e0] sm:$0xff] %v2213_v33  ;;  %v2214_v41 = vmax.f32 %v2086_v28, %v1853_v38  ;;  %2281 = vst [vmem:[#allocation2 + $0x100] sm:$0xff] %v2153_v35  ;;  %v2154_v42 = vmax.f32 %v2026_v31, %v1613_v40  ;;  %v2097_v28 = vld [vmem:[#allocation2 + $0x340] sm:$0xff]  ;;  %v2100_v31 = vld [vmem:[#allocation2 + $0x358] sm:$0xff] }
 0x3be   : > { %2344 = vst [vmem:[#allocation2 + $0x2f8] sm:$0xff] %v2216_v37  ;;  %2284 = vst [vmem:[#allocation2 + $0x118] sm:$0xff] %v2156_v39  ;;  %v2040_v34 = vld [vmem:[#allocation2 + $0x178] sm:$0xff]  ;;  %v2098_v37 = vld [vmem:[#allocation2 + $0x348] sm:$0xff] }
 0x3bf   : > { %2342 = vst [vmem:[#allocation2 + $0x2e8] sm:$0xff] %v2214_v41  ;;  %2282 = vst [vmem:[#allocation2 + $0x108] sm:$0xff] %v2154_v42  ;;  %v2038_v40 = vld [vmem:[#allocation2 + $0x168] sm:$0xff] }
 0x3c1   : > { %v3085_v50 = vpop.f32.mrb[36].mxu1  ;;  %v3025_v52 = vpop.f32.mrb[52].mxu0 }
 0x3c2   : > { %v2219_v54 = vmax.f32 %v2091_v43, %v3085_v50  ;;  %v1866_v55 = vpop.f32.mrb[37].mxu1  ;;  %v2159_v57 = vmax.f32 %v2031_v47, %v3025_v52  ;;  %v1626_v58 = vpop.f32.mrb[53].mxu0 }
 0x3c3   : > { %v2217_v60 = vmax.f32 %v2089_v48, %v1866_v55  ;;  %v3086_v61 = vpop.f32.mrb[38].mxu1  ;;  %v2157_v62 = vmax.f32 %v2029_v49, %v1626_v58  ;;  %v3026_v63 = vpop.f32.mrb[54].mxu0  ;;  %v2043_v55 = vld [vmem:[#allocation2 + $0x190] sm:$0xff] }
 0x3c4   : > { %2347 = vst [vmem:[#allocation2 + $0x310] sm:$0xff] %v2219_v54  ;;  %v2220_v0 = vmax.f32 %v2092_v51, %v3086_v61  ;;  %v1869_v1 = vpop.f32.mrb[39].mxu1  ;;  %2287 = vst [vmem:[#allocation2 + $0x130] sm:$0xff] %v2159_v57  ;;  %v2160_v32 = vmax.f32 %v2032_v53, %v3026_v63  ;;  %v1629_v2 = vpop.f32.mrb[55].mxu0  ;;  %v2103_v54 = vld [vmem:[#allocation2 + $0x370] sm:$0xff]  ;;  %v2041_v57 = vld [vmem:[#allocation2 + $0x180] sm:$0xff] }
 0x3c5   : > { %2345 = vst [vmem:[#allocation2 + $0x300] sm:$0xff] %v2217_v60  ;;  %v2218_v3 = vmax.f32 %v2090_v56, %v1869_v1  ;;  %2285 = vst [vmem:[#allocation2 + $0x120] sm:$0xff] %v2157_v62  ;;  %v2158_v44 = vmax.f32 %v2030_v59, %v1629_v2  ;;  %v2101_v56 = vld [vmem:[#allocation2 + $0x360] sm:$0xff]  ;;  %v2104_v59 = vld [vmem:[#allocation2 + $0x378] sm:$0xff] }
 0x3c6   : > { %2348 = vst [vmem:[#allocation2 + $0x318] sm:$0xff] %v2220_v0  ;;  %2288 = vst [vmem:[#allocation2 + $0x138] sm:$0xff] %v2160_v32  ;;  %v2044_v61 = vld [vmem:[#allocation2 + $0x198] sm:$0xff]  ;;  %v2102_v0 = vld [vmem:[#allocation2 + $0x368] sm:$0xff] }
 0x3c7   : > { %2346 = vst [vmem:[#allocation2 + $0x308] sm:$0xff] %v2218_v3  ;;  %2286 = vst [vmem:[#allocation2 + $0x128] sm:$0xff] %v2158_v44  ;;  %v2042_v2 = vld [vmem:[#allocation2 + $0x188] sm:$0xff] }
 0x3c9   : > { %v3089_v6 = vpop.f32.mrb[40].mxu1  ;;  %v3029_v8 = vpop.f32.mrb[56].mxu0 }
 0x3ca   : > { %v2223_v10 = vmax.f32 %v2095_v45, %v3089_v6  ;;  %v1882_v11 = vpop.f32.mrb[41].mxu1  ;;  %v2163_v13 = vmax.f32 %v2035_v46, %v3029_v8  ;;  %v1642_v14 = vpop.f32.mrb[57].mxu0 }
 0x3cb   : > { %v2221_v16 = vmax.f32 %v2093_v4, %v1882_v11  ;;  %v3090_v17 = vpop.f32.mrb[42].mxu1  ;;  %v2161_v18 = vmax.f32 %v2033_v5, %v1642_v14  ;;  %v3030_v19 = vpop.f32.mrb[58].mxu0  ;;  %v2047_v11 = vld [vmem:[#allocation2 + $0x1b0] sm:$0xff] }
 0x3cc   : > { %2351 = vst [vmem:[#allocation2 + $0x330] sm:$0xff] %v2223_v10  ;;  %v2224_v20 = vmax.f32 %v2096_v7, %v3090_v17  ;;  %v1885_v21 = vpop.f32.mrb[43].mxu1  ;;  %2291 = vst [vmem:[#allocation2 + $0x150] sm:$0xff] %v2163_v13  ;;  %v2164_v22 = vmax.f32 %v2036_v9, %v3030_v19  ;;  %v1645_v23 = vpop.f32.mrb[59].mxu0  ;;  %v2107_v10 = vld [vmem:[#allocation2 + $0x390] sm:$0xff]  ;;  %v2045_v13 = vld [vmem:[#allocation2 + $0x1a0] sm:$0xff] }
 0x3cd   : > { %2349 = vst [vmem:[#allocation2 + $0x320] sm:$0xff] %v2221_v16  ;;  %v2222_v24 = vmax.f32 %v2094_v12, %v1885_v21  ;;  %2289 = vst [vmem:[#allocation2 + $0x140] sm:$0xff] %v2161_v18  ;;  %v2162_v25 = vmax.f32 %v2034_v15, %v1645_v23  ;;  %v2105_v12 = vld [vmem:[#allocation2 + $0x380] sm:$0xff]  ;;  %v2108_v15 = vld [vmem:[#allocation2 + $0x398] sm:$0xff] }
 0x3ce   : > { %2352 = vst [vmem:[#allocation2 + $0x338] sm:$0xff] %v2224_v20  ;;  %2292 = vst [vmem:[#allocation2 + $0x158] sm:$0xff] %v2164_v22  ;;  %v2048_v17 = vld [vmem:[#allocation2 + $0x1b8] sm:$0xff]  ;;  %v2106_v20 = vld [vmem:[#allocation2 + $0x388] sm:$0xff] }
 0x3cf   : > { %2350 = vst [vmem:[#allocation2 + $0x328] sm:$0xff] %v2222_v24  ;;  %2290 = vst [vmem:[#allocation2 + $0x148] sm:$0xff] %v2162_v25  ;;  %v2046_v23 = vld [vmem:[#allocation2 + $0x1a8] sm:$0xff] }
 0x3d1   : > { %v3093_v30 = vpop.f32.mrb[44].mxu1  ;;  %v3033_v33 = vpop.f32.mrb[60].mxu0 }
 0x3d2   : > { %v2227_v35 = vmax.f32 %v2099_v26, %v3093_v30  ;;  %v1898_v36 = vpop.f32.mrb[45].mxu1  ;;  %v2167_v38 = vmax.f32 %v2039_v27, %v3033_v33  ;;  %v1658_v39 = vpop.f32.mrb[61].mxu0 }
 0x3d3   : > { %v2225_v41 = vmax.f32 %v2097_v28, %v1898_v36  ;;  %v3094_v42 = vpop.f32.mrb[46].mxu1  ;;  %v2165_v43 = vmax.f32 %v2037_v29, %v1658_v39  ;;  %v3034_v47 = vpop.f32.mrb[62].mxu0  ;;  %v2051_v36 = vld [vmem:[#allocation2 + $0x1d0] sm:$0xff] }
 0x3d4   : > { %2355 = vst [vmem:[#allocation2 + $0x350] sm:$0xff] %v2227_v35  ;;  %v2228_v48 = vmax.f32 %v2100_v31, %v3094_v42  ;;  %v1901_v49 = vpop.f32.mrb[47].mxu1  ;;  %2295 = vst [vmem:[#allocation2 + $0x170] sm:$0xff] %v2167_v38  ;;  %v2168_v50 = vmax.f32 %v2040_v34, %v3034_v47  ;;  %v1661_v51 = vpop.f32.mrb[63].mxu0  ;;  %v2111_v35 = vld [vmem:[#allocation2 + $0x3b0] sm:$0xff]  ;;  %v2049_v38 = vld [vmem:[#allocation2 + $0x1c0] sm:$0xff] }
 0x3d5   : > { %2353 = vst [vmem:[#allocation2 + $0x340] sm:$0xff] %v2225_v41  ;;  %v2226_v52 = vmax.f32 %v2098_v37, %v1901_v49  ;;  %2293 = vst [vmem:[#allocation2 + $0x160] sm:$0xff] %v2165_v43  ;;  %v2166_v53 = vmax.f32 %v2038_v40, %v1661_v51  ;;  %v2109_v37 = vld [vmem:[#allocation2 + $0x3a0] sm:$0xff]  ;;  %v2112_v40 = vld [vmem:[#allocation2 + $0x3b8] sm:$0xff] }
 0x3d6   : > { %2356 = vst [vmem:[#allocation2 + $0x358] sm:$0xff] %v2228_v48  ;;  %2296 = vst [vmem:[#allocation2 + $0x178] sm:$0xff] %v2168_v50  ;;  %v2052_v42 = vld [vmem:[#allocation2 + $0x1d8] sm:$0xff]  ;;  %v2110_v48 = vld [vmem:[#allocation2 + $0x3a8] sm:$0xff] }
 0x3d7   : > { %2354 = vst [vmem:[#allocation2 + $0x348] sm:$0xff] %v2226_v52  ;;  %2294 = vst [vmem:[#allocation2 + $0x168] sm:$0xff] %v2166_v53  ;;  %v2050_v51 = vld [vmem:[#allocation2 + $0x1c8] sm:$0xff] }
 0x3d9   : > { %v3097_v58 = vpop.f32.mrb[48].mxu1  ;;  %v3037_v60 = vpop.f32.mrb[64].mxu0 }
 0x3da   : > { %v2231_v62 = vmax.f32 %v2103_v54, %v3097_v58  ;;  %v1914_v63 = vpop.f32.mrb[49].mxu1  ;;  %v2171_v1 = vmax.f32 %v2043_v55, %v3037_v60  ;;  %v1674_v32 = vpop.f32.mrb[65].mxu0 }
 0x3db   : > { %v2229_v3 = vmax.f32 %v2101_v56, %v1914_v63  ;;  %v3098_v44 = vpop.f32.mrb[50].mxu1  ;;  %v2169_v45 = vmax.f32 %v2041_v57, %v1674_v32  ;;  %v3038_v46 = vpop.f32.mrb[66].mxu0  ;;  %v2113_v63 = vld [vmem:[#allocation2 + $0x3c0] sm:$0xff] }
 0x3dc   : > { %2359 = vst [vmem:[#allocation2 + $0x370] sm:$0xff] %v2231_v62  ;;  %v2232_v4 = vmax.f32 %v2104_v59, %v3098_v44  ;;  %v1917_v5 = vpop.f32.mrb[51].mxu1  ;;  %2299 = vst [vmem:[#allocation2 + $0x190] sm:$0xff] %v2171_v1  ;;  %v2172_v6 = vmax.f32 %v2044_v61, %v3038_v46  ;;  %v1677_v7 = vpop.f32.mrb[67].mxu0  ;;  %v2115_v62 = vld [vmem:[#allocation2 + $0x3d0] sm:$0xff]  ;;  %v2116_v1 = vld [vmem:[#allocation2 + $0x3d8] sm:$0xff] }
 0x3dd   : > { %2357 = vst [vmem:[#allocation2 + $0x360] sm:$0xff] %v2229_v3  ;;  %v2230_v8 = vmax.f32 %v2102_v0, %v1917_v5  ;;  %2297 = vst [vmem:[#allocation2 + $0x180] sm:$0xff] %v2169_v45  ;;  %v2170_v9 = vmax.f32 %v2042_v2, %v1677_v7  ;;  %v2114_v3 = vld [vmem:[#allocation2 + $0x3c8] sm:$0xff]  ;;  %v2117_v7 = vld [vmem:[#allocation2 + $0x3e0] sm:$0xff] }
 0x3de   : > { %2360 = vst [vmem:[#allocation2 + $0x378] sm:$0xff] %v2232_v4  ;;  %2300 = vst [vmem:[#allocation2 + $0x198] sm:$0xff] %v2172_v6  ;;  %v2119_v6 = vld [vmem:[#allocation2 + $0x3f0] sm:$0xff] }
 0x3df   : > { %2358 = vst [vmem:[#allocation2 + $0x368] sm:$0xff] %v2230_v8  ;;  %2298 = vst [vmem:[#allocation2 + $0x188] sm:$0xff] %v2170_v9  ;;  %v2120_v9 = vld [vmem:[#allocation2 + $0x3f8] sm:$0xff] }
 0x3e1   : > { %v3101_v14 = vpop.f32.mrb[52].mxu1  ;;  %v3041_v16 = vpop.f32.mrb[68].mxu0 }
 0x3e2   : > { %v2235_v18 = vmax.f32 %v2107_v10, %v3101_v14  ;;  %v1930_v19 = vpop.f32.mrb[53].mxu1  ;;  %v2175_v21 = vmax.f32 %v2047_v11, %v3041_v16  ;;  %v1690_v22 = vpop.f32.mrb[69].mxu0 }
 0x3e3   : > { %v2233_v24 = vmax.f32 %v2105_v12, %v1930_v19  ;;  %v3102_v25 = vpop.f32.mrb[54].mxu1  ;;  %v2173_v26 = vmax.f32 %v2045_v13, %v1690_v22  ;;  %v3042_v27 = vpop.f32.mrb[70].mxu0  ;;  %v2118_v12 = vld [vmem:[#allocation2 + $0x3e8] sm:$0xff]  ;;  %v2385_v22 = vld [vmem:[#allocation2 + $0x20] sm:$0xff] (!%p2856_p10) }
 0x3e4   : > { %2363 = vst [vmem:[#allocation2 + $0x390] sm:$0xff] %v2235_v18  ;;  %v2236_v28 = vmax.f32 %v2108_v15, %v3102_v25  ;;  %v1933_v29 = vpop.f32.mrb[55].mxu1  ;;  %2303 = vst [vmem:[#allocation2 + $0x1b0] sm:$0xff] %v2175_v21  ;;  %v2176_v30 = vmax.f32 %v2048_v17, %v3042_v27  ;;  %v1693_v31 = vpop.f32.mrb[71].mxu0  ;;  %v2381_v18 = vld [vmem:[#allocation2] sm:$0xff] (!%p2856_p10)  ;;  %v2382_v19 = vld [vmem:[#allocation2 + $0x8] sm:$0xff] (!%p2856_p10) }
 0x3e5   : > { %2361 = vst [vmem:[#allocation2 + $0x380] sm:$0xff] %v2233_v24  ;;  %v2234_v33 = vmax.f32 %v2106_v20, %v1933_v29  ;;  %2301 = vst [vmem:[#allocation2 + $0x1a0] sm:$0xff] %v2173_v26  ;;  %v2174_v34 = vmax.f32 %v2046_v23, %v1693_v31  ;;  %v2383_v20 = vld [vmem:[#allocation2 + $0x10] sm:$0xff] (!%p2856_p10)  ;;  %v2384_v21 = vld [vmem:[#allocation2 + $0x18] sm:$0xff] (!%p2856_p10) }
 0x3e6   : > { %2364 = vst [vmem:[#allocation2 + $0x398] sm:$0xff] %v2236_v28  ;;  %2304 = vst [vmem:[#allocation2 + $0x1b8] sm:$0xff] %v2176_v30  ;;  %v2386_v23 = vld [vmem:[#allocation2 + $0x28] sm:$0xff] (!%p2856_p10)  ;;  %v2387_v24 = vld [vmem:[#allocation2 + $0x30] sm:$0xff] (!%p2856_p10) }
 0x3e7   : > { %2362 = vst [vmem:[#allocation2 + $0x388] sm:$0xff] %v2234_v33  ;;  %2302 = vst [vmem:[#allocation2 + $0x1a8] sm:$0xff] %v2174_v34  ;;  %v2388_v25 = vld [vmem:[#allocation2 + $0x38] sm:$0xff] (!%p2856_p10)  ;;  %v2389_v26 = vld [vmem:[#allocation2 + $0x40] sm:$0xff] (!%p2856_p10) }
 0x3e8   : > { %2509 = vst [vmem:[%s3818_s27] sm:$0xff] (!%p2856_p10), %v2381_v18  ;;  %2510 = vst [vmem:[%s3818_s27 + $0x8] sm:$0xff] (!%p2856_p10), %v2382_v19  ;;  %v2390_v27 = vld [vmem:[#allocation2 + $0x48] sm:$0xff] (!%p2856_p10)  ;;  %v2391_v28 = vld [vmem:[#allocation2 + $0x50] sm:$0xff] (!%p2856_p10) }
 0x3e9   : > { %v3105_v39 = vpop.f32.mrb[56].mxu1  ;;  %v3045_v41 = vpop.f32.mrb[72].mxu0  ;;  %2511 = vst [vmem:[%s3818_s27 + $0x10] sm:$0xff] (!%p2856_p10), %v2383_v20  ;;  %2512 = vst [vmem:[%s3818_s27 + $0x18] sm:$0xff] (!%p2856_p10), %v2384_v21  ;;  %v2392_v29 = vld [vmem:[#allocation2 + $0x58] sm:$0xff] (!%p2856_p10)  ;;  %v2393_v30 = vld [vmem:[#allocation2 + $0x60] sm:$0xff] (!%p2856_p10) }
 0x3ea   : > { %v2239_v43 = vmax.f32 %v2111_v35, %v3105_v39  ;;  %v1946_v47 = vpop.f32.mrb[57].mxu1  ;;  %v2179_v49 = vmax.f32 %v2051_v36, %v3045_v41  ;;  %v1706_v50 = vpop.f32.mrb[73].mxu0  ;;  %2513 = vst [vmem:[%s3818_s27 + $0x20] sm:$0xff] (!%p2856_p10), %v2385_v22  ;;  %2514 = vst [vmem:[%s3818_s27 + $0x28] sm:$0xff] (!%p2856_p10), %v2386_v23  ;;  %v2394_v31 = vld [vmem:[#allocation2 + $0x68] sm:$0xff] (!%p2856_p10)  ;;  %v2395_v33 = vld [vmem:[#allocation2 + $0x70] sm:$0xff] (!%p2856_p10) }
 0x3eb   : > { %v2237_v52 = vmax.f32 %v2109_v37, %v1946_v47  ;;  %v3106_v53 = vpop.f32.mrb[58].mxu1  ;;  %v2177_v54 = vmax.f32 %v2049_v38, %v1706_v50  ;;  %v3046_v55 = vpop.f32.mrb[74].mxu0  ;;  %2515 = vst [vmem:[%s3818_s27 + $0x30] sm:$0xff] (!%p2856_p10), %v2387_v24  ;;  %2516 = vst [vmem:[%s3818_s27 + $0x38] sm:$0xff] (!%p2856_p10), %v2388_v25  ;;  %v2396_v34 = vld [vmem:[#allocation2 + $0x78] sm:$0xff] (!%p2856_p10)  ;;  %v2397_v35 = vld [vmem:[#allocation2 + $0x80] sm:$0xff] (!%p2856_p10) }
 0x3ec   : > { %2367 = vst [vmem:[#allocation2 + $0x3b0] sm:$0xff] %v2239_v43  ;;  %v2240_v56 = vmax.f32 %v2112_v40, %v3106_v53  ;;  %v1949_v57 = vpop.f32.mrb[59].mxu1  ;;  %2307 = vst [vmem:[#allocation2 + $0x1d0] sm:$0xff] %v2179_v49  ;;  %v2180_v58 = vmax.f32 %v2052_v42, %v3046_v55  ;;  %v1709_v59 = vpop.f32.mrb[75].mxu0  ;;  %v2398_v36 = vld [vmem:[#allocation2 + $0x88] sm:$0xff] (!%p2856_p10)  ;;  %v2399_v37 = vld [vmem:[#allocation2 + $0x90] sm:$0xff] (!%p2856_p10) }
 0x3ed   : > { %2365 = vst [vmem:[#allocation2 + $0x3a0] sm:$0xff] %v2237_v52  ;;  %v2238_v60 = vmax.f32 %v2110_v48, %v1949_v57  ;;  %2305 = vst [vmem:[#allocation2 + $0x1c0] sm:$0xff] %v2177_v54  ;;  %v2178_v61 = vmax.f32 %v2050_v51, %v1709_v59  ;;  %v2400_v38 = vld [vmem:[#allocation2 + $0x98] sm:$0xff] (!%p2856_p10)  ;;  %v2401_v39 = vld [vmem:[#allocation2 + $0xa0] sm:$0xff] (!%p2856_p10) }
 0x3ee   : > { %2368 = vst [vmem:[#allocation2 + $0x3b8] sm:$0xff] %v2240_v56  ;;  %2308 = vst [vmem:[#allocation2 + $0x1d8] sm:$0xff] %v2180_v58  ;;  %v2402_v40 = vld [vmem:[#allocation2 + $0xa8] sm:$0xff] (!%p2856_p10)  ;;  %v2403_v41 = vld [vmem:[#allocation2 + $0xb0] sm:$0xff] (!%p2856_p10) }
 0x3ef   : > { %2366 = vst [vmem:[#allocation2 + $0x3a8] sm:$0xff] %v2238_v60  ;;  %2306 = vst [vmem:[#allocation2 + $0x1c8] sm:$0xff] %v2178_v61  ;;  %v2404_v42 = vld [vmem:[#allocation2 + $0xb8] sm:$0xff] (!%p2856_p10)  ;;  %v2405_v43 = vld [vmem:[#allocation2 + $0xc0] sm:$0xff] (!%p2856_p10) }
 0x3f0   : > { %2517 = vst [vmem:[%s3818_s27 + $0x40] sm:$0xff] (!%p2856_p10), %v2389_v26  ;;  %2518 = vst [vmem:[%s3818_s27 + $0x48] sm:$0xff] (!%p2856_p10), %v2390_v27  ;;  %v2406_v47 = vld [vmem:[#allocation2 + $0xc8] sm:$0xff] (!%p2856_p10)  ;;  %v2407_v48 = vld [vmem:[#allocation2 + $0xd0] sm:$0xff] (!%p2856_p10) }
 0x3f1   : > { %v3109_v0 = vpop.f32.mrb[60].mxu1  ;;  %2519 = vst [vmem:[%s3818_s27 + $0x50] sm:$0xff] (!%p2856_p10), %v2391_v28  ;;  %2520 = vst [vmem:[%s3818_s27 + $0x58] sm:$0xff] (!%p2856_p10), %v2392_v29  ;;  %v2408_v49 = vld [vmem:[#allocation2 + $0xd8] sm:$0xff] (!%p2856_p10)  ;;  %v2409_v50 = vld [vmem:[#allocation2 + $0xe0] sm:$0xff] (!%p2856_p10) }
 0x3f2   : > { %v2243_v32 = vmax.f32 %v2115_v62, %v3109_v0  ;;  %v1962_v2 = vpop.f32.mrb[61].mxu1  ;;  %2521 = vst [vmem:[%s3818_s27 + $0x60] sm:$0xff] (!%p2856_p10), %v2393_v30  ;;  %2522 = vst [vmem:[%s3818_s27 + $0x68] sm:$0xff] (!%p2856_p10), %v2394_v31  ;;  %v2410_v51 = vld [vmem:[#allocation2 + $0xe8] sm:$0xff] (!%p2856_p10)  ;;  %v2411_v52 = vld [vmem:[#allocation2 + $0xf0] sm:$0xff] (!%p2856_p10) }
 0x3f3   : > { %v2241_v44 = vmax.f32 %v2113_v63, %v1962_v2  ;;  %v3110_v45 = vpop.f32.mrb[62].mxu1  ;;  %2523 = vst [vmem:[%s3818_s27 + $0x70] sm:$0xff] (!%p2856_p10), %v2395_v33  ;;  %2524 = vst [vmem:[%s3818_s27 + $0x78] sm:$0xff] (!%p2856_p10), %v2396_v34  ;;  %v2412_v53 = vld [vmem:[#allocation2 + $0xf8] sm:$0xff] (!%p2856_p10)  ;;  %v2413_v54 = vld [vmem:[#allocation2 + $0x100] sm:$0xff] (!%p2856_p10) }
 0x3f4   : > { %2371 = vst [vmem:[#allocation2 + $0x3d0] sm:$0xff] %v2243_v32  ;;  %v2244_v46 = vmax.f32 %v2116_v1, %v3110_v45  ;;  %v1965_v4 = vpop.f32.mrb[63].mxu1  ;;  %2525 = vst [vmem:[%s3818_s27 + $0x80] sm:$0xff] (!%p2856_p10), %v2397_v35  ;;  %v2414_v55 = vld [vmem:[#allocation2 + $0x108] sm:$0xff] (!%p2856_p10)  ;;  %v2415_v56 = vld [vmem:[#allocation2 + $0x110] sm:$0xff] (!%p2856_p10) }
 0x3f5   : > { %2369 = vst [vmem:[#allocation2 + $0x3c0] sm:$0xff] %v2241_v44  ;;  %v2242_v5 = vmax.f32 %v2114_v3, %v1965_v4  ;;  %2526 = vst [vmem:[%s3818_s27 + $0x88] sm:$0xff] (!%p2856_p10), %v2398_v36  ;;  %v2416_v57 = vld [vmem:[#allocation2 + $0x118] sm:$0xff] (!%p2856_p10)  ;;  %v2417_v58 = vld [vmem:[#allocation2 + $0x120] sm:$0xff] (!%p2856_p10) }
 0x3f6   : > { %2372 = vst [vmem:[#allocation2 + $0x3d8] sm:$0xff] %v2244_v46  ;;  %2527 = vst [vmem:[%s3818_s27 + $0x90] sm:$0xff] (!%p2856_p10), %v2399_v37  ;;  %v2418_v59 = vld [vmem:[#allocation2 + $0x128] sm:$0xff] (!%p2856_p10)  ;;  %v2419_v60 = vld [vmem:[#allocation2 + $0x130] sm:$0xff] (!%p2856_p10) }
 0x3f7   : > { %2370 = vst [vmem:[#allocation2 + $0x3c8] sm:$0xff] %v2242_v5  ;;  %2528 = vst [vmem:[%s3818_s27 + $0x98] sm:$0xff] (!%p2856_p10), %v2400_v38  ;;  %v2420_v61 = vld [vmem:[#allocation2 + $0x138] sm:$0xff] (!%p2856_p10)  ;;  %v2421_v62 = vld [vmem:[#allocation2 + $0x140] sm:$0xff] (!%p2856_p10) }
 0x3f8   : > { %2529 = vst [vmem:[%s3818_s27 + $0xa0] sm:$0xff] (!%p2856_p10), %v2401_v39  ;;  %2530 = vst [vmem:[%s3818_s27 + $0xa8] sm:$0xff] (!%p2856_p10), %v2402_v40  ;;  %v2422_v63 = vld [vmem:[#allocation2 + $0x148] sm:$0xff] (!%p2856_p10)  ;;  %v2423_v0 = vld [vmem:[#allocation2 + $0x150] sm:$0xff] (!%p2856_p10) }
 0x3f9   : > { %v3113_v8 = vpop.f32.mrb[64].mxu1  ;;  %2380 = sbr.rel (%p2856_p10) target bundleno = 1072 (0x430), region = 56  ;;  %2531 = vst [vmem:[%s3818_s27 + $0xb0] sm:$0xff] (!%p2856_p10), %v2403_v41  ;;  %2532 = vst [vmem:[%s3818_s27 + $0xb8] sm:$0xff] (!%p2856_p10), %v2404_v42  ;;  %v2424_v1 = vld [vmem:[#allocation2 + $0x158] sm:$0xff] (!%p2856_p10)  ;;  %v2425_v32 = vld [vmem:[#allocation2 + $0x160] sm:$0xff] (!%p2856_p10) }
 0x3fa   : > { %v2247_v10 = vmax.f32 %v2119_v6, %v3113_v8  ;;  %v1978_v11 = vpop.f32.mrb[65].mxu1  ;;  %2533 = vst [vmem:[%s3818_s27 + $0xc0] sm:$0xff] (!%p2856_p10), %v2405_v43  ;;  %2534 = vst [vmem:[%s3818_s27 + $0xc8] sm:$0xff] (!%p2856_p10), %v2406_v47  ;;  %v2426_v2 = vld [vmem:[#allocation2 + $0x168] sm:$0xff] (!%p2856_p10)  ;;  %v2427_v3 = vld [vmem:[#allocation2 + $0x170] sm:$0xff] (!%p2856_p10) }
 0x3fb   : > { %v2245_v13 = vmax.f32 %v2117_v7, %v1978_v11  ;;  %v3114_v14 = vpop.f32.mrb[66].mxu1  ;;  %2535 = vst [vmem:[%s3818_s27 + $0xd0] sm:$0xff] (!%p2856_p10), %v2407_v48  ;;  %2536 = vst [vmem:[%s3818_s27 + $0xd8] sm:$0xff] (!%p2856_p10), %v2408_v49  ;;  %v2428_v44 = vld [vmem:[#allocation2 + $0x178] sm:$0xff] (!%p2856_p10)  ;;  %v2429_v45 = vld [vmem:[#allocation2 + $0x180] sm:$0xff] (!%p2856_p10) }
 0x3fc   : > { %2375 = vst [vmem:[#allocation2 + $0x3f0] sm:$0xff] %v2247_v10  ;;  %v2248_v15 = vmax.f32 %v2120_v9, %v3114_v14  ;;  %v1981_v16 = vpop.f32.mrb[67].mxu1  ;;  %2537 = vst [vmem:[%s3818_s27 + $0xe0] sm:$0xff] (!%p2856_p10), %v2409_v50  ;;  %v2430_v46 = vld [vmem:[#allocation2 + $0x188] sm:$0xff] (!%p2856_p10)  ;;  %v2431_v4 = vld [vmem:[#allocation2 + $0x190] sm:$0xff] (!%p2856_p10) }
 0x3fd   : > { %2373 = vst [vmem:[#allocation2 + $0x3e0] sm:$0xff] %v2245_v13  ;;  %v2246_v17 = vmax.f32 %v2118_v12, %v1981_v16  ;;  %2538 = vst [vmem:[%s3818_s27 + $0xe8] sm:$0xff] (!%p2856_p10), %v2410_v51  ;;  %v2432_v5 = vld [vmem:[#allocation2 + $0x198] sm:$0xff] (!%p2856_p10)  ;;  %v2433_v6 = vld [vmem:[#allocation2 + $0x1a0] sm:$0xff] (!%p2856_p10) }
 0x3fe   : > { %2376 = vst [vmem:[#allocation2 + $0x3f8] sm:$0xff] %v2248_v15  ;;  %2539 = vst [vmem:[%s3818_s27 + $0xf0] sm:$0xff] (!%p2856_p10), %v2411_v52  ;;  %v2434_v7 = vld [vmem:[#allocation2 + $0x1a8] sm:$0xff] (!%p2856_p10)  ;;  %v2435_v8 = vld [vmem:[#allocation2 + $0x1b0] sm:$0xff] (!%p2856_p10) }
 0x3ff   : > { %2374 = vst [vmem:[#allocation2 + $0x3e8] sm:$0xff] %v2246_v17  ;;  %2540 = vst [vmem:[%s3818_s27 + $0xf8] sm:$0xff] (!%p2856_p10), %v2412_v53  ;;  %v2436_v9 = vld [vmem:[#allocation2 + $0x1b8] sm:$0xff] (!%p2856_p10)  ;;  %v2437_v10 = vld [vmem:[#allocation2 + $0x1c0] sm:$0xff] (!%p2856_p10) }
 0x400   : > { %2541 = vst [vmem:[%s3818_s27 + $0x100] sm:$0xff] %v2413_v54  ;;  %2542 = vst [vmem:[%s3818_s27 + $0x108] sm:$0xff] %v2414_v55  ;;  %v2438_v11 = vld [vmem:[#allocation2 + $0x1c8] sm:$0xff]  ;;  %v2439_v12 = vld [vmem:[#allocation2 + $0x1d0] sm:$0xff] }
 0x401   : > { %2543 = vst [vmem:[%s3818_s27 + $0x110] sm:$0xff] %v2415_v56  ;;  %2544 = vst [vmem:[%s3818_s27 + $0x118] sm:$0xff] %v2416_v57  ;;  %v2440_v13 = vld [vmem:[#allocation2 + $0x1d8] sm:$0xff]  ;;  %v2441_v14 = vld [vmem:[#allocation2 + $0x1e0] sm:$0xff] }
 0x402   : > { %2545 = vst [vmem:[%s3818_s27 + $0x120] sm:$0xff] %v2417_v58  ;;  %2546 = vst [vmem:[%s3818_s27 + $0x128] sm:$0xff] %v2418_v59  ;;  %v2442_v15 = vld [vmem:[#allocation2 + $0x1e8] sm:$0xff]  ;;  %v2443_v16 = vld [vmem:[#allocation2 + $0x1f0] sm:$0xff] }
 0x403   : > { %2547 = vst [vmem:[%s3818_s27 + $0x130] sm:$0xff] %v2419_v60  ;;  %2548 = vst [vmem:[%s3818_s27 + $0x138] sm:$0xff] %v2420_v61  ;;  %v2444_v17 = vld [vmem:[#allocation2 + $0x1f8] sm:$0xff]  ;;  %v2445_v18 = vld [vmem:[#allocation2 + $0x200] sm:$0xff] }
 0x404   : > { %2549 = vst [vmem:[%s3818_s27 + $0x140] sm:$0xff] %v2421_v62  ;;  %2550 = vst [vmem:[%s3818_s27 + $0x148] sm:$0xff] %v2422_v63  ;;  %v2446_v19 = vld [vmem:[#allocation2 + $0x208] sm:$0xff]  ;;  %v2447_v20 = vld [vmem:[#allocation2 + $0x210] sm:$0xff] }
 0x405   : > { %2551 = vst [vmem:[%s3818_s27 + $0x150] sm:$0xff] %v2423_v0  ;;  %2552 = vst [vmem:[%s3818_s27 + $0x158] sm:$0xff] %v2424_v1  ;;  %v2448_v21 = vld [vmem:[#allocation2 + $0x218] sm:$0xff]  ;;  %v2449_v22 = vld [vmem:[#allocation2 + $0x220] sm:$0xff] }
 0x406   : > { %2553 = vst [vmem:[%s3818_s27 + $0x160] sm:$0xff] %v2425_v32  ;;  %2554 = vst [vmem:[%s3818_s27 + $0x168] sm:$0xff] %v2426_v2  ;;  %v2450_v23 = vld [vmem:[#allocation2 + $0x228] sm:$0xff]  ;;  %v2451_v24 = vld [vmem:[#allocation2 + $0x230] sm:$0xff] }
 0x407   : > { %2555 = vst [vmem:[%s3818_s27 + $0x170] sm:$0xff] %v2427_v3  ;;  %2556 = vst [vmem:[%s3818_s27 + $0x178] sm:$0xff] %v2428_v44  ;;  %v2452_v25 = vld [vmem:[#allocation2 + $0x238] sm:$0xff]  ;;  %v2453_v26 = vld [vmem:[#allocation2 + $0x240] sm:$0xff] }
 0x408   : > { %2557 = vst [vmem:[%s3818_s27 + $0x180] sm:$0xff] %v2429_v45  ;;  %2558 = vst [vmem:[%s3818_s27 + $0x188] sm:$0xff] %v2430_v46  ;;  %v2454_v27 = vld [vmem:[#allocation2 + $0x248] sm:$0xff]  ;;  %v2455_v28 = vld [vmem:[#allocation2 + $0x250] sm:$0xff] }
 0x409   : > { %2559 = vst [vmem:[%s3818_s27 + $0x190] sm:$0xff] %v2431_v4  ;;  %2560 = vst [vmem:[%s3818_s27 + $0x198] sm:$0xff] %v2432_v5  ;;  %v2456_v29 = vld [vmem:[#allocation2 + $0x258] sm:$0xff]  ;;  %v2457_v30 = vld [vmem:[#allocation2 + $0x260] sm:$0xff] }
 0x40a   : > { %2561 = vst [vmem:[%s3818_s27 + $0x1a0] sm:$0xff] %v2433_v6  ;;  %2562 = vst [vmem:[%s3818_s27 + $0x1a8] sm:$0xff] %v2434_v7  ;;  %v2458_v31 = vld [vmem:[#allocation2 + $0x268] sm:$0xff]  ;;  %v2459_v33 = vld [vmem:[#allocation2 + $0x270] sm:$0xff] }
 0x40b   : > { %2563 = vst [vmem:[%s3818_s27 + $0x1b0] sm:$0xff] %v2435_v8  ;;  %2564 = vst [vmem:[%s3818_s27 + $0x1b8] sm:$0xff] %v2436_v9  ;;  %v2460_v34 = vld [vmem:[#allocation2 + $0x278] sm:$0xff]  ;;  %v2461_v35 = vld [vmem:[#allocation2 + $0x280] sm:$0xff] }
 0x40c   : > { %2565 = vst [vmem:[%s3818_s27 + $0x1c0] sm:$0xff] %v2437_v10  ;;  %2566 = vst [vmem:[%s3818_s27 + $0x1c8] sm:$0xff] %v2438_v11  ;;  %v2462_v36 = vld [vmem:[#allocation2 + $0x288] sm:$0xff]  ;;  %v2463_v37 = vld [vmem:[#allocation2 + $0x290] sm:$0xff] }
 0x40d   : > { %2567 = vst [vmem:[%s3818_s27 + $0x1d0] sm:$0xff] %v2439_v12  ;;  %2568 = vst [vmem:[%s3818_s27 + $0x1d8] sm:$0xff] %v2440_v13  ;;  %v2464_v38 = vld [vmem:[#allocation2 + $0x298] sm:$0xff]  ;;  %v2465_v39 = vld [vmem:[#allocation2 + $0x2a0] sm:$0xff] }
 0x40e   : > { %2569 = vst [vmem:[%s3818_s27 + $0x1e0] sm:$0xff] %v2441_v14  ;;  %2570 = vst [vmem:[%s3818_s27 + $0x1e8] sm:$0xff] %v2442_v15  ;;  %v2466_v40 = vld [vmem:[#allocation2 + $0x2a8] sm:$0xff]  ;;  %v2467_v41 = vld [vmem:[#allocation2 + $0x2b0] sm:$0xff] }
 0x40f   : > { %2571 = vst [vmem:[%s3818_s27 + $0x1f0] sm:$0xff] %v2443_v16  ;;  %2572 = vst [vmem:[%s3818_s27 + $0x1f8] sm:$0xff] %v2444_v17  ;;  %v2468_v42 = vld [vmem:[#allocation2 + $0x2b8] sm:$0xff]  ;;  %v2469_v43 = vld [vmem:[#allocation2 + $0x2c0] sm:$0xff] }
 0x410   : > { %2573 = vst [vmem:[%s3818_s27 + $0x200] sm:$0xff] %v2445_v18  ;;  %2574 = vst [vmem:[%s3818_s27 + $0x208] sm:$0xff] %v2446_v19  ;;  %v2470_v47 = vld [vmem:[#allocation2 + $0x2c8] sm:$0xff]  ;;  %v2471_v48 = vld [vmem:[#allocation2 + $0x2d0] sm:$0xff] }
 0x411   : > { %2575 = vst [vmem:[%s3818_s27 + $0x210] sm:$0xff] %v2447_v20  ;;  %2576 = vst [vmem:[%s3818_s27 + $0x218] sm:$0xff] %v2448_v21  ;;  %v2472_v49 = vld [vmem:[#allocation2 + $0x2d8] sm:$0xff]  ;;  %v2473_v50 = vld [vmem:[#allocation2 + $0x2e0] sm:$0xff] }
 0x412   : > { %2577 = vst [vmem:[%s3818_s27 + $0x220] sm:$0xff] %v2449_v22  ;;  %2578 = vst [vmem:[%s3818_s27 + $0x228] sm:$0xff] %v2450_v23  ;;  %v2474_v51 = vld [vmem:[#allocation2 + $0x2e8] sm:$0xff]  ;;  %v2475_v52 = vld [vmem:[#allocation2 + $0x2f0] sm:$0xff] }
 0x413   : > { %2579 = vst [vmem:[%s3818_s27 + $0x230] sm:$0xff] %v2451_v24  ;;  %2580 = vst [vmem:[%s3818_s27 + $0x238] sm:$0xff] %v2452_v25  ;;  %v2476_v53 = vld [vmem:[#allocation2 + $0x2f8] sm:$0xff]  ;;  %v2477_v54 = vld [vmem:[#allocation2 + $0x300] sm:$0xff] }
 0x414   : > { %2581 = vst [vmem:[%s3818_s27 + $0x240] sm:$0xff] %v2453_v26  ;;  %2582 = vst [vmem:[%s3818_s27 + $0x248] sm:$0xff] %v2454_v27  ;;  %v2478_v55 = vld [vmem:[#allocation2 + $0x308] sm:$0xff]  ;;  %v2479_v56 = vld [vmem:[#allocation2 + $0x310] sm:$0xff] }
 0x415   : > { %2583 = vst [vmem:[%s3818_s27 + $0x250] sm:$0xff] %v2455_v28  ;;  %2584 = vst [vmem:[%s3818_s27 + $0x258] sm:$0xff] %v2456_v29  ;;  %v2480_v57 = vld [vmem:[#allocation2 + $0x318] sm:$0xff]  ;;  %v2481_v58 = vld [vmem:[#allocation2 + $0x320] sm:$0xff] }
 0x416   : > { %2585 = vst [vmem:[%s3818_s27 + $0x260] sm:$0xff] %v2457_v30  ;;  %2586 = vst [vmem:[%s3818_s27 + $0x268] sm:$0xff] %v2458_v31  ;;  %v2482_v59 = vld [vmem:[#allocation2 + $0x328] sm:$0xff]  ;;  %v2483_v60 = vld [vmem:[#allocation2 + $0x330] sm:$0xff] }
 0x417   : > { %2587 = vst [vmem:[%s3818_s27 + $0x270] sm:$0xff] %v2459_v33  ;;  %2588 = vst [vmem:[%s3818_s27 + $0x278] sm:$0xff] %v2460_v34  ;;  %v2484_v61 = vld [vmem:[#allocation2 + $0x338] sm:$0xff]  ;;  %v2485_v62 = vld [vmem:[#allocation2 + $0x340] sm:$0xff] }
 0x418   : > { %2589 = vst [vmem:[%s3818_s27 + $0x280] sm:$0xff] %v2461_v35  ;;  %2590 = vst [vmem:[%s3818_s27 + $0x288] sm:$0xff] %v2462_v36  ;;  %v2486_v63 = vld [vmem:[#allocation2 + $0x348] sm:$0xff]  ;;  %v2487_v0 = vld [vmem:[#allocation2 + $0x350] sm:$0xff] }
 0x419   : > { %2591 = vst [vmem:[%s3818_s27 + $0x290] sm:$0xff] %v2463_v37  ;;  %2592 = vst [vmem:[%s3818_s27 + $0x298] sm:$0xff] %v2464_v38  ;;  %v2488_v1 = vld [vmem:[#allocation2 + $0x358] sm:$0xff]  ;;  %v2489_v32 = vld [vmem:[#allocation2 + $0x360] sm:$0xff] }
 0x41a   : > { %2593 = vst [vmem:[%s3818_s27 + $0x2a0] sm:$0xff] %v2465_v39  ;;  %2594 = vst [vmem:[%s3818_s27 + $0x2a8] sm:$0xff] %v2466_v40  ;;  %v2490_v2 = vld [vmem:[#allocation2 + $0x368] sm:$0xff]  ;;  %v2491_v3 = vld [vmem:[#allocation2 + $0x370] sm:$0xff] }
 0x41b   : > { %2595 = vst [vmem:[%s3818_s27 + $0x2b0] sm:$0xff] %v2467_v41  ;;  %2596 = vst [vmem:[%s3818_s27 + $0x2b8] sm:$0xff] %v2468_v42  ;;  %v2492_v44 = vld [vmem:[#allocation2 + $0x378] sm:$0xff]  ;;  %v2493_v45 = vld [vmem:[#allocation2 + $0x380] sm:$0xff] }
 0x41c   : > { %2597 = vst [vmem:[%s3818_s27 + $0x2c0] sm:$0xff] %v2469_v43  ;;  %2598 = vst [vmem:[%s3818_s27 + $0x2c8] sm:$0xff] %v2470_v47  ;;  %v2494_v46 = vld [vmem:[#allocation2 + $0x388] sm:$0xff]  ;;  %v2495_v4 = vld [vmem:[#allocation2 + $0x390] sm:$0xff] }
 0x41d   : > { %2599 = vst [vmem:[%s3818_s27 + $0x2d0] sm:$0xff] %v2471_v48  ;;  %2600 = vst [vmem:[%s3818_s27 + $0x2d8] sm:$0xff] %v2472_v49  ;;  %v2496_v5 = vld [vmem:[#allocation2 + $0x398] sm:$0xff]  ;;  %v2497_v6 = vld [vmem:[#allocation2 + $0x3a0] sm:$0xff] }
 0x41e   : > { %2601 = vst [vmem:[%s3818_s27 + $0x2e0] sm:$0xff] %v2473_v50  ;;  %2602 = vst [vmem:[%s3818_s27 + $0x2e8] sm:$0xff] %v2474_v51  ;;  %v2498_v7 = vld [vmem:[#allocation2 + $0x3a8] sm:$0xff]  ;;  %v2499_v8 = vld [vmem:[#allocation2 + $0x3b0] sm:$0xff] }
 0x41f   : > { %2603 = vst [vmem:[%s3818_s27 + $0x2f0] sm:$0xff] %v2475_v52  ;;  %2604 = vst [vmem:[%s3818_s27 + $0x2f8] sm:$0xff] %v2476_v53  ;;  %v2500_v9 = vld [vmem:[#allocation2 + $0x3b8] sm:$0xff]  ;;  %v2501_v10 = vld [vmem:[#allocation2 + $0x3c0] sm:$0xff] }
 0x420   : > { %2605 = vst [vmem:[%s3818_s27 + $0x300] sm:$0xff] %v2477_v54  ;;  %2606 = vst [vmem:[%s3818_s27 + $0x308] sm:$0xff] %v2478_v55  ;;  %v2502_v11 = vld [vmem:[#allocation2 + $0x3c8] sm:$0xff]  ;;  %v2503_v12 = vld [vmem:[#allocation2 + $0x3d0] sm:$0xff] }
 0x421   : > { %2607 = vst [vmem:[%s3818_s27 + $0x310] sm:$0xff] %v2479_v56  ;;  %2608 = vst [vmem:[%s3818_s27 + $0x318] sm:$0xff] %v2480_v57  ;;  %v2504_v13 = vld [vmem:[#allocation2 + $0x3d8] sm:$0xff]  ;;  %v2505_v14 = vld [vmem:[#allocation2 + $0x3e0] sm:$0xff] }
 0x422   : > { %2609 = vst [vmem:[%s3818_s27 + $0x320] sm:$0xff] %v2481_v58  ;;  %2610 = vst [vmem:[%s3818_s27 + $0x328] sm:$0xff] %v2482_v59  ;;  %v2506_v15 = vld [vmem:[#allocation2 + $0x3e8] sm:$0xff]  ;;  %v2507_v16 = vld [vmem:[#allocation2 + $0x3f0] sm:$0xff] }
 0x423   : > { %2611 = vst [vmem:[%s3818_s27 + $0x330] sm:$0xff] %v2483_v60  ;;  %2612 = vst [vmem:[%s3818_s27 + $0x338] sm:$0xff] %v2484_v61  ;;  %v2508_v17 = vld [vmem:[#allocation2 + $0x3f8] sm:$0xff] }
 0x424   : > { %2613 = vst [vmem:[%s3818_s27 + $0x340] sm:$0xff] %v2485_v62  ;;  %2614 = vst [vmem:[%s3818_s27 + $0x348] sm:$0xff] %v2486_v63 }
 0x425   : > { %2615 = vst [vmem:[%s3818_s27 + $0x350] sm:$0xff] %v2487_v0  ;;  %2616 = vst [vmem:[%s3818_s27 + $0x358] sm:$0xff] %v2488_v1 }
 0x426   : > { %2617 = vst [vmem:[%s3818_s27 + $0x360] sm:$0xff] %v2489_v32  ;;  %2618 = vst [vmem:[%s3818_s27 + $0x368] sm:$0xff] %v2490_v2 }
 0x427   : > { %2619 = vst [vmem:[%s3818_s27 + $0x370] sm:$0xff] %v2491_v3  ;;  %2620 = vst [vmem:[%s3818_s27 + $0x378] sm:$0xff] %v2492_v44 }
 0x428   : > { %2621 = vst [vmem:[%s3818_s27 + $0x380] sm:$0xff] %v2493_v45  ;;  %2622 = vst [vmem:[%s3818_s27 + $0x388] sm:$0xff] %v2494_v46 }
 0x429   : > { %2623 = vst [vmem:[%s3818_s27 + $0x390] sm:$0xff] %v2495_v4  ;;  %2624 = vst [vmem:[%s3818_s27 + $0x398] sm:$0xff] %v2496_v5 }
 0x42a   : > { %2625 = vst [vmem:[%s3818_s27 + $0x3a0] sm:$0xff] %v2497_v6  ;;  %2626 = vst [vmem:[%s3818_s27 + $0x3a8] sm:$0xff] %v2498_v7 }
 0x42b   : > { %2627 = vst [vmem:[%s3818_s27 + $0x3b0] sm:$0xff] %v2499_v8  ;;  %2628 = vst [vmem:[%s3818_s27 + $0x3b8] sm:$0xff] %v2500_v9 }
 0x42c   : > { %2629 = vst [vmem:[%s3818_s27 + $0x3c0] sm:$0xff] %v2501_v10  ;;  %2630 = vst [vmem:[%s3818_s27 + $0x3c8] sm:$0xff] %v2502_v11 }
 0x42d   : > { %2631 = vst [vmem:[%s3818_s27 + $0x3d0] sm:$0xff] %v2503_v12  ;;  %2632 = vst [vmem:[%s3818_s27 + $0x3d8] sm:$0xff] %v2504_v13 }
 0x42e   : > { %2633 = vst [vmem:[%s3818_s27 + $0x3e0] sm:$0xff] %v2505_v14  ;;  %2634 = vst [vmem:[%s3818_s27 + $0x3e8] sm:$0xff] %v2506_v15 }
 0x42f   : > { %2635 = vst [vmem:[%s3818_s27 + $0x3f0] sm:$0xff] %v2507_v16  ;;  %2636 = vst [vmem:[%s3818_s27 + $0x3f8] sm:$0xff] %v2508_v17 }
 0x430 PF: > { %s4356_s13 = sld [smem:[#allocation14_spill]]  ;;  %s4357_s15 = sld [smem:[#allocation15_spill]] }
 0x431   : > { %s4358_s18 = sld [smem:[#allocation17_spill]]  ;;  %s2653_s8 = sshll.u32 %s3818_s27, 4  ;;  %s4220_s8 = int_to_ptr.vmem [resolvable:$true] %s2653_s8 }
 0x432   : > { %s4359_s6 = sld [smem:[#allocation25_spill]]  ;;  %s4229_s5 = scalar_lea.sflag [#allocation5], %s283_s12 }
 0x433   : > { %s3420_s16 = scalar_lea.vmem %s4220_s8, 16384  ;;  %s3573_s27 = smov [#allocation8]  }
 0x434   : > { %p3421_p11 = scmp.ne.s32.totalorder %s4220_s8, %s3420_s16  ;;  %s3424_s17 = sshll.u32 %s3573_s27, 4  ;;  %s3425_s17 = int_to_ptr.vmem [resolvable:$false] %s3424_s17 }
 0x435   : > { %p3427_p3 = scmp.lt.s32.totalorder %s4220_s8, %s3425_s17 }
 0x436   : > { %s2858_s21 = sshll.u32 %s4356_s13, 7  ;;  %s2859_s4 = sshll.u32 %s4357_s15, 8 }
 0x437   : > { %s2650_s9 = sadd.s32 %s2859_s4, %s2858_s21  ;;  %p4360_p13 = scmp.ne.s32.totalorder %s4358_s18, 0 }
 0x438   : > { %s2860_s3 = sshll.u32 %s2650_s9, 7  ;;  %s3426_s13 = scalar_lea.vmem %s3425_s17, 32768 }
 0x439   : > { %s4225_s11 = scalar_lea.hbm %s4359_s6, %s2860_s3  ;;  %p3422_p0 = pnand %p3421_p11, %p4360_p13 }
 0x43a   : > { %p3428_p7 = scmp.lt.s32.totalorder %s3426_s13, %s3420_s16 }
 0x43b   : > { %p3423_p2 = pneg %p3422_p0 }
 0x43c   : > { %p3429_p9 = por %p3428_p7, %p3427_p3 }
 0x43e   : > { %p3430_p1 = pnand %p3429_p9, %p3423_p2 }
 0x440   : > { %3433 = shalt.err (!%p3430_p1)
}
 0x441   : > { %s3434_s12 = scalar_lea.hbm %s4225_s11, 16384  ;;  %s3438_s4 = scalar_lea.hbm %s4359_s6, 98304 }
 0x442   : > { %p3435_p4 = scmp.ne.s32.totalorder %s4225_s11, %s3434_s12  ;;  %p3439_p6 = scmp.lt.u32.totalorder %s4225_s11, %s4359_s6 }
 0x443   : > { %p3440_p5 = scmp.lt.u32.totalorder %s3438_s4, %s3434_s12  ;;  %p3442_p11 = scmp.lt.u32.totalorder %s3434_s12, %s4225_s11 }
 0x444   : > { %p3436_p12 = pnand %p3435_p4, %p4360_p13 }
 0x445   : > { %p3441_p10 = por %p3440_p5, %p3439_p6 }
 0x446   : > { %p3437_p8 = pneg %p3436_p12 }
 0x447   : > { %p3443_p0 = por %p3442_p11, %p3441_p10 }
 0x449   : > { %p3444_p2 = pnand %p3443_p0, %p3437_p8 }
 0x44b   : > { %3447 = shalt.err (!%p3444_p2)
}
 0x44c   : > { %s3574_s25 = smov 128   ;;  %s3575_s26 = smov 8  }
 0x44d   : > { %3137 = dma.vmem_to_hbm [thread:$0]  (%p4360_p13), %s4220_s8, 16384, %s4225_s11, %s4229_s5, %s3574_s25, %s3574_s25, %s3575_s26  }
 0x44e PF: > { %s4361_s16 = sld [smem:[#allocation12_spill]]  ;;  %s4362_s27 = sld [smem:[#allocation18_spill]] }
 0x44f   : > { %p3154_p3 = scmp.ge.s32.totalorder %s3562_s30, 2 }
 0x454   : > { %s2668_s17 = sand.u32 1, %s4361_s16   ;;  %p4363_p7 = scmp.ne.s32.totalorder %s4362_s27, 0 }
 0x455   : > { %s2669_s13 = scalar_lea.sflag [#allocation5], %s2668_s17 }
 0x456   : > { %p3148_p9 = pnand %p3154_p3, %p4363_p7 }
 0x458   : > { %3509 = dma.done.wait (!%p3148_p9), %s2669_s13, 16384  }
 0x459   : > { %3511 = vsyncadd (!%p3148_p9), %s2669_s13, 4294950912  ;;  %s22_s30 = sadd.s32 1, %s3562_s30   ;;  %s4365_s8 = sld [smem:[#allocation16_spill]] }
 0x45a   : > { %p4258_p1 = scmp.ge.s32.totalorder %s22_s30, 14   ;;  %s4366_s27 = sld [smem:[#allocation19_spill]] }
 0x45b   : > { %s4367_s11 = sld [smem:[#allocation20_spill]]  ;;  %s4368_s18 = smov %s3518_s19 }
 0x45c   : > { %s4369_s19 = smov %s3522_s20  ;;  %s4370_s20 = smov %s3759_s24 }
 0x45d   : > { %s4371_s21 = smov %s3530_s22  ;;  %s4372_s22 = smov %s3534_s23 }
 0x45e   : > { %s4373_s23 = smov %s3756_s1  ;;  %s4375_s25 = smov %s3554_s28 }
 0x45f   : > { %s4374_s24 = smov %s4365_s8  ;;  %s4376_s26 = smov %s3558_s29 }
 0x460   : > { %s4378_s29 = smov %s4388_s7  ;;  %21 = sbr.rel (!%p4258_p1) target bundleno = 17 (0x11), region = 97 }
 0x461   : > { %s4377_s28 = smov %s4367_s11 }
 0x467   :  { %2674 = vsyncpa [#allocation4], 1 }
 0x468   :  { %2676 = vsyncpa [#allocation4 + $0x1], 1 }
 0x469   :  { %2677 = vsyncpa [#allocation7], 1 }
 0x46a   :  { %2678 = vsyncpa [#allocation5], 1 }
 0x46b   :  { %2680 = vsyncpa [#allocation5 + $0x1], 1 }

</bundles_post_ra>
